<compile_context>
chip_gen: v6e
topology: v6e:2x2x1
jax: 0.10.0
libtpu: 0.0.40
codegen_flags: <defaults>
</compile_context>

<pallas_src>
import jax
import jax.numpy as jnp
from jax.experimental import pallas as pl
from jax.experimental.pallas import tpu as pltpu

NUM_NODES = 8
HIDDEN_SIZE = 32        # BioGPT encoder hidden size (small synthetic stand-in)
GNN_HIDDEN = 16         # gnn_hidden_dim (small synthetic stand-in)
HEADS1 = 4              # GATv2Conv #1 heads (concat) -> output dim = 4 * GNN_HIDDEN
HEADS2 = 1              # GATv2Conv #2 heads          -> output dim = GNN_HIDDEN
NEG_SLOPE = 0.2         # GATv2Conv default leaky_relu negative_slope

HC1 = HEADS1 * GNN_HIDDEN          # 64
HC2 = HEADS2 * GNN_HIDDEN          # 16

# ---- packed-parameter buffer layout (one lane-dense f32 (176, 128) slab) -----------
ROW_WLR1 = 0       # rows [  0,  32): wlr1   (32, 128)  = [lin_l | lin_r] layer 1
ROW_BLR1 = 32      # row    32      : blr1   ( 1, 128)
ROW_BIAS1 = 33     # row    33      : bias1  ( 1,  64)
ROW_BLR2 = 34      # row    34      : blr2   ( 1,  32)
ROW_BIAS2 = 35     # row    35      : bias2  ( 1,  16)
ROW_ATT2 = 36      # row    36      : att2   ( 1,  16)
ROW_HMASK1 = 40    # rows [ 40,  44): hmask1 ( 4,  64)  head -> channel selector
ROW_ATTBD1 = 48    # rows [ 48, 112): attbd1 (64,   4)  block-diagonal attention
ROW_WLR2 = 112     # rows [112, 176): wlr2   (64,  32)  = [lin_l | lin_r] layer 2
PARAM_ROWS = 176
PARAM_COLS = 128


def _fused_gnn_kernel(x_ref, nbias_ref, p_ref, out_ref):
    """One graph per grid step: both GATv2Conv layers (+ ReLUs) entirely in VMEM.

    x_ref     : (1, N, Fin)   node features for this graph
    nbias_ref : (1, N, N)     additive edge mask bias [dst, src]: 0 edge / -1e30 no edge
    p_ref     : (176, 128)    packed parameters (VMEM-resident across the whole grid)
    out_ref   : (1, N, C)     final node representations
    """
    x = x_ref[0]                                   # (N, 32)  f32
    nbias = nbias_ref[0]                           # (N, N)   0 / -1e30
    n = x.shape[0]

    # ---------------- layer 1: GATv2Conv(H=4, C=16, concat) + ReLU ------------------
    wlr1 = p_ref[ROW_WLR1:ROW_WLR1 + 32, :]                    # (32, 128)
    blr1 = p_ref[ROW_BLR1:ROW_BLR1 + 1, :]                     # (1, 128)
    bias1 = p_ref[ROW_BIAS1:ROW_BIAS1 + 1, 0:HC1]              # (1, 64)
    hmask1 = p_ref[ROW_HMASK1:ROW_HMASK1 + HEADS1, 0:HC1]      # (4, 64)
    attbd1 = p_ref[ROW_ATTBD1:ROW_ATTBD1 + HC1, 0:HEADS1]      # (64, 4)

    # Fused source|target projection: one lane-dense MXU matmul.
    xlr = jnp.dot(x, wlr1, preferred_element_type=jnp.float32) + blr1      # (N, 128)
    xl = xlr[:, :HC1]          # source-side features  ("lin_l")
    xr = xlr[:, HC1:]          # target-side features  ("lin_r")

    # GATv2 scores for all heads: z[i, j, :] = xr[i] + xl[j], then leaky_relu.
    z = xr[:, None, :] + xl[None, :, :]                                    # (N, N, 64)
    z = jnp.where(z > 0, z, NEG_SLOPE * z)
    # Per-head reduction on the MXU against the block-diagonal attention matrix.
    e = jnp.dot(z.reshape(n * n, HC1), attbd1,
                preferred_element_type=jnp.float32).reshape(n, n, HEADS1)  # (N, N, 4)
    e = e + nbias[:, :, None]                                              # mask non-edges

    # Masked softmax over incoming edges (src axis = 1), all heads at once.
    e = e - jnp.max(e, axis=1, keepdims=True)
    prob = jnp.exp(e)                                                      # masked -> 0
    denom = jnp.sum(prob, axis=1, keepdims=True)                           # (N, 1, 4)
    alpha = prob * pl.reciprocal(denom, approx=True)                       # (N, N, 4)

    # Head-batched aggregation: expand per-head alpha to per-channel gates on the MXU,
    # weight source features, reduce over src.
    gate = jnp.dot(alpha.reshape(n * n, HEADS1), hmask1,
                   preferred_element_type=jnp.float32).reshape(n, n, HC1)  # (N, N, 64)
    h1 = jnp.sum(gate * xl[None, :, :], axis=1) + bias1                    # (N, 64)
    h1 = jnp.maximum(h1, 0.0)                                              # F.relu

    # F.dropout(p=0.1, training=False) -> identity in eval mode.

    # ---------------- layer 2: GATv2Conv(H=1, C=16) + ReLU --------------------------
    wlr2 = p_ref[ROW_WLR2:ROW_WLR2 + HC1, 0:2 * HC2]           # (64, 32)
    blr2 = p_ref[ROW_BLR2:ROW_BLR2 + 1, 0:2 * HC2]             # (1, 32)
    bias2 = p_ref[ROW_BIAS2:ROW_BIAS2 + 1, 0:HC2]              # (1, 16)
    att2 = p_ref[ROW_ATT2:ROW_ATT2 + 1, 0:HC2]                 # (1, 16)

    xlr2 = jnp.dot(h1, wlr2, preferred_element_type=jnp.float32) + blr2    # (N, 32)
    xl2 = xlr2[:, :HC2]
    xr2 = xlr2[:, HC2:]

    z2 = xr2[:, None, :] + xl2[None, :, :]                                 # (N, N, 16)
    z2 = jnp.where(z2 > 0, z2, NEG_SLOPE * z2)
    e2 = jnp.sum(z2 * att2[None, :, :], axis=-1)                           # (N, N)
    e2 = e2 + nbias                                                        # mask non-edges

    e2 = e2 - jnp.max(e2, axis=-1, keepdims=True)
    p2 = jnp.exp(e2)
    denom2 = jnp.sum(p2, axis=-1, keepdims=True)                           # (N, 1)
    alpha2 = p2 * pl.reciprocal(denom2, approx=True)                       # (N, N)

    # heads==1 aggregation: single MXU matmul (no broadcast-mult / sublane reduce).
    h2 = jnp.dot(alpha2, xl2, preferred_element_type=jnp.float32) + bias2  # (N, 16)
    out_ref[0, :, :] = jnp.maximum(h2, 0.0)                                # F.relu


# ----------------------------- host-side parameter prep ------------------------------
def _glorot(key, shape):
    fan_in, fan_out = shape[0], shape[-1]
    limit = (6.0 / (fan_in + fan_out)) ** 0.5
    return jax.random.uniform(key, shape, jnp.float32, -limit, limit)


def init_gatv2_params(key, fin, heads, out_ch):
    k_wl, k_wr, k_att = jax.random.split(key, 3)
    hc = heads * out_ch
    wl = _glorot(k_wl, (fin, hc))
    bl = jnp.zeros((1, hc), jnp.float32)
    wr = _glorot(k_wr, (fin, hc))
    br = jnp.zeros((1, hc), jnp.float32)
    att = _glorot(k_att, (heads, out_ch))
    bias = jnp.zeros((1, hc), jnp.float32)
    return (wl, bl, wr, br, att, bias)


def pack_all_params(params1, params2):
    """Pack both GATv2 layers into one lane-dense (176, 128) f32 buffer."""
    wl1, bl1, wr1, br1, att1, b1 = params1
    wl2, bl2, wr2, br2, att2, b2 = params2

    wlr1 = jnp.concatenate([wl1, wr1], axis=1)                    # (32, 128)
    blr1 = jnp.concatenate([bl1, br1], axis=1)                    # (1, 128)
    eye1 = jnp.eye(HEADS1, dtype=jnp.float32)
    # attbd1[h*C + c, h'] = att1[h, c] * delta(h, h')
    attbd1 = (att1[:, :, None] * eye1[:, None, :]).reshape(HC1, HEADS1)   # (64, 4)
    # hmask1[h, h'*C + c] = delta(h, h')
    hmask1 = jnp.repeat(eye1, GNN_HIDDEN, axis=1)                 # (4, 64)

    wlr2 = jnp.concatenate([wl2, wr2], axis=1)                    # (64, 32)
    blr2 = jnp.concatenate([bl2, br2], axis=1)                    # (1, 32)
    att2v = att2.reshape(1, HC2)                                  # (1, 16)

    buf = jnp.zeros((PARAM_ROWS, PARAM_COLS), jnp.float32)
    buf = buf.at[ROW_WLR1:ROW_WLR1 + 32, :].set(wlr1)
    buf = buf.at[ROW_BLR1:ROW_BLR1 + 1, :].set(blr1)
    buf = buf.at[ROW_BIAS1:ROW_BIAS1 + 1, 0:HC1].set(b1)
    buf = buf.at[ROW_BLR2:ROW_BLR2 + 1, 0:2 * HC2].set(blr2)
    buf = buf.at[ROW_BIAS2:ROW_BIAS2 + 1, 0:HC2].set(b2)
    buf = buf.at[ROW_ATT2:ROW_ATT2 + 1, 0:HC2].set(att2v)
    buf = buf.at[ROW_HMASK1:ROW_HMASK1 + HEADS1, 0:HC1].set(hmask1)
    buf = buf.at[ROW_ATTBD1:ROW_ATTBD1 + HC1, 0:HEADS1].set(attbd1)
    buf = buf.at[ROW_WLR2:ROW_WLR2 + HC1, 0:2 * HC2].set(wlr2)
    return buf


def build_neg_bias(edge_index, num_nodes):
    """Additive mask bias [dst, src]: 0 where edge (incl. self loops), -1e30 otherwise."""
    src = edge_index[0]
    dst = edge_index[1]
    adj = jnp.zeros((num_nodes, num_nodes), jnp.float32).at[dst, src].set(1.0)
    adj = jnp.maximum(adj, jnp.eye(num_nodes, dtype=jnp.float32))   # add_self_loops=True
    return (adj - 1.0) * jnp.float32(1e30)


# --------------------------------- pallas_call wrapper -------------------------------
@jax.jit
def biogpt_relation_extractor_forward(x_batch, nbias_batch, params):
    g, n, fin = x_batch.shape
    return pl.pallas_call(
        _fused_gnn_kernel,
        out_shape=jax.ShapeDtypeStruct((g, n, GNN_HIDDEN), jnp.float32),
        grid=(g,),
        in_specs=[
            pl.BlockSpec((1, n, fin), lambda i: (i, 0, 0)),          # per-graph features
            pl.BlockSpec((1, n, n), lambda i: (i, 0, 0)),            # per-graph mask bias
            pl.BlockSpec((PARAM_ROWS, PARAM_COLS), lambda i: (0, 0)),  # weights: resident
        ],
        out_specs=pl.BlockSpec((1, n, GNN_HIDDEN), lambda i: (i, 0, 0)),
        compiler_params=pltpu.CompilerParams(
            dimension_semantics=("parallel",)),
    )(x_batch, nbias_batch, params)


if __name__ == "__main__":
    key = jax.random.PRNGKey(0)
    k_x, k_p1, k_p2 = jax.random.split(key, 3)

    # Synthetic batch of graphs: 4 graphs x 8 nodes, bidirectional rings of varying stride.
    NUM_GRAPHS = 4
    x_batch = jax.random.normal(k_x, (NUM_GRAPHS, NUM_NODES, HIDDEN_SIZE), jnp.float32)

    nbias_list = []
    for gi in range(NUM_GRAPHS):
        src = jnp.arange(NUM_NODES, dtype=jnp.int32)
        dst = (src + 1 + gi % 3) % NUM_NODES
        edge_index = jnp.stack([jnp.concatenate([src, dst]),
                                jnp.concatenate([dst, src])], axis=0)    # (2, 16)
        nbias_list.append(build_neg_bias(edge_index, NUM_NODES))
    nbias_batch = jnp.stack(nbias_list, axis=0)                          # (G, N, N)

    params1 = init_gatv2_params(k_p1, HIDDEN_SIZE, HEADS1, GNN_HIDDEN)
    params2 = init_gatv2_params(k_p2, HEADS1 * GNN_HIDDEN, HEADS2, GNN_HIDDEN)
    params = pack_all_params(params1, params2)                           # (176, 128)

    out = biogpt_relation_extractor_forward(x_batch, nbias_batch, params)
    out = jax.block_until_ready(out)

    assert out.shape == (NUM_GRAPHS, NUM_NODES, GNN_HIDDEN)
    assert bool(jnp.all(jnp.isfinite(out)))
    assert bool(jnp.all(out >= 0.0))  # final ReLU
    # TODO(synk): feature dropout + attention dropout are eval-mode identity here.
    print("KERNEL_OK")
</pallas_src>

<mosaic_0001>
module attributes {stable_mosaic.version = 11 : i64} {
  func.func @_fused_gnn_kernel(%arg0: i32, %arg1: memref<1x8x32xf32, #tpu.memory_space<vmem>>, %arg2: memref<1x8x8xf32, #tpu.memory_space<vmem>>, %arg3: memref<176x128xf32, #tpu.memory_space<vmem>>, %arg4: memref<1x8x16xf32, #tpu.memory_space<vmem>>) attributes {dimension_semantics = [#tpu.dimension_semantics<parallel>], iteration_bounds = array<i64: 4>, scalar_prefetch = 0 : i64, scratch_operands = 0 : i64, tpu.core_type = #tpu.core_type<tc>, window_params = [{transform_indices = @transform_0, window_bounds = array<i64: 1, 8, 32>}, {transform_indices = @transform_1, window_bounds = array<i64: 1, 8, 8>}, {pipeline_mode = #tpu.pipeline_mode<synchronous>, transform_indices = @transform_2, window_bounds = array<i64: 176, 128>}, {transform_indices = @transform_3, window_bounds = array<i64: 1, 8, 16>}]} {
    %c0 = arith.constant 0 : index
    %c0_0 = arith.constant 0 : index
    %c0_1 = arith.constant 0 : index
    %0 = vector.load %arg1[%c0, %c0_0, %c0_1] : memref<1x8x32xf32, #tpu.memory_space<vmem>>, vector<1x8x32xf32>
    %1 = vector.shape_cast %0 : vector<1x8x32xf32> to vector<8x32xf32>
    %c0_2 = arith.constant 0 : index
    %c0_3 = arith.constant 0 : index
    %c0_4 = arith.constant 0 : index
    %2 = vector.load %arg2[%c0_2, %c0_3, %c0_4] : memref<1x8x8xf32, #tpu.memory_space<vmem>>, vector<1x8x8xf32>
    %3 = vector.shape_cast %2 : vector<1x8x8xf32> to vector<8x8xf32>
    %c0_5 = arith.constant 0 : index
    %c0_6 = arith.constant 0 : index
    %4 = vector.load %arg3[%c0_5, %c0_6] : memref<176x128xf32, #tpu.memory_space<vmem>>, vector<32x128xf32>
    %c32 = arith.constant 32 : index
    %c0_7 = arith.constant 0 : index
    %5 = vector.load %arg3[%c32, %c0_7] : memref<176x128xf32, #tpu.memory_space<vmem>>, vector<1x128xf32>
    %c33 = arith.constant 33 : index
    %c0_8 = arith.constant 0 : index
    %6 = vector.load %arg3[%c33, %c0_8] : memref<176x128xf32, #tpu.memory_space<vmem>>, vector<1x64xf32>
    %c40 = arith.constant 40 : index
    %c0_9 = arith.constant 0 : index
    %7 = vector.load %arg3[%c40, %c0_9] : memref<176x128xf32, #tpu.memory_space<vmem>>, vector<4x64xf32>
    %c48 = arith.constant 48 : index
    %c0_10 = arith.constant 0 : index
    %8 = vector.load %arg3[%c48, %c0_10] : memref<176x128xf32, #tpu.memory_space<vmem>>, vector<64x4xf32>
    %cst = arith.constant dense<0.000000e+00> : vector<8x128xf32>
    %9 = tpu.matmul %1, %4, %cst {dimension_numbers = #tpu.dot_dimension_numbers<[1], [0], [0], [1], [0, 0, 1, 1], [], []>} : vector<8x32xf32>, vector<32x128xf32>, vector<8x128xf32> -> vector<8x128xf32>
    %10 = vector.broadcast %5 : vector<1x128xf32> to vector<8x128xf32>
    %11 = arith.addf %9, %10 : vector<8x128xf32>
    %12 = vector.extract_strided_slice %11 {offsets = [0, 0], sizes = [8, 64], strides = [1, 1]} : vector<8x128xf32> to vector<8x64xf32>
    %13 = vector.extract_strided_slice %11 {offsets = [0, 64], sizes = [8, 64], strides = [1, 1]} : vector<8x128xf32> to vector<8x64xf32>
    %14 = vector.shape_cast %13 : vector<8x64xf32> to vector<8x1x64xf32>
    %15 = vector.shape_cast %12 : vector<8x64xf32> to vector<1x8x64xf32>
    %16 = vector.broadcast %14 : vector<8x1x64xf32> to vector<8x8x64xf32>
    %17 = vector.broadcast %15 : vector<1x8x64xf32> to vector<8x8x64xf32>
    %18 = arith.addf %16, %17 : vector<8x8x64xf32>
    %cst_11 = arith.constant 0.000000e+00 : f32
    %19 = vector.broadcast %cst_11 : f32 to vector<8x8x64xf32>
    %20 = arith.cmpf ogt, %18, %19 : vector<8x8x64xf32>
    %cst_12 = arith.constant 2.000000e-01 : f32
    %21 = vector.broadcast %cst_12 : f32 to vector<8x8x64xf32>
    %22 = arith.mulf %21, %18 : vector<8x8x64xf32>
    %23 = arith.select %20, %18, %22 : vector<8x8x64xi1>, vector<8x8x64xf32>
    %24 = vector.shape_cast %23 : vector<8x8x64xf32> to vector<64x64xf32>
    %cst_13 = arith.constant dense<0.000000e+00> : vector<64x4xf32>
    %25 = tpu.matmul %24, %8, %cst_13 {dimension_numbers = #tpu.dot_dimension_numbers<[1], [0], [0], [1], [0, 0, 1, 1], [], []>} : vector<64x64xf32>, vector<64x4xf32>, vector<64x4xf32> -> vector<64x4xf32>
    %26 = vector.shape_cast %25 : vector<64x4xf32> to vector<8x8x4xf32>
    %27 = vector.shape_cast %3 : vector<8x8xf32> to vector<8x8x1xf32>
    %28 = vector.broadcast %27 : vector<8x8x1xf32> to vector<8x8x4xf32>
    %29 = arith.addf %26, %28 : vector<8x8x4xf32>
    %cst_14 = arith.constant dense<0xFF800000> : vector<8x4xf32>
    %30 = vector.multi_reduction <maximumf>, %29, %cst_14 [1] : vector<8x8x4xf32> to vector<8x4xf32>
    %31 = vector.shape_cast %30 : vector<8x4xf32> to vector<8x1x4xf32>
    %32 = vector.broadcast %31 : vector<8x1x4xf32> to vector<8x8x4xf32>
    %33 = arith.subf %29, %32 : vector<8x8x4xf32>
    %34 = math.exp %33 : vector<8x8x4xf32>
    %cst_15 = arith.constant dense<0.000000e+00> : vector<8x4xf32>
    %35 = vector.multi_reduction <add>, %34, %cst_15 [1] : vector<8x8x4xf32> to vector<8x4xf32>
    %36 = vector.shape_cast %35 : vector<8x4xf32> to vector<8x1x4xf32>
    %37 = tpu.reciprocal %36 {approx = true} : vector<8x1x4xf32> -> vector<8x1x4xf32>
    %38 = vector.broadcast %37 : vector<8x1x4xf32> to vector<8x8x4xf32>
    %39 = arith.mulf %34, %38 : vector<8x8x4xf32>
    %40 = vector.shape_cast %39 : vector<8x8x4xf32> to vector<64x4xf32>
    %cst_16 = arith.constant dense<0.000000e+00> : vector<64x64xf32>
    %41 = tpu.matmul %40, %7, %cst_16 {dimension_numbers = #tpu.dot_dimension_numbers<[1], [0], [0], [1], [0, 0, 1, 1], [], []>} : vector<64x4xf32>, vector<4x64xf32>, vector<64x64xf32> -> vector<64x64xf32>
    %42 = vector.shape_cast %41 : vector<64x64xf32> to vector<8x8x64xf32>
    %43 = vector.shape_cast %12 : vector<8x64xf32> to vector<1x8x64xf32>
    %44 = vector.broadcast %43 : vector<1x8x64xf32> to vector<8x8x64xf32>
    %45 = arith.mulf %42, %44 : vector<8x8x64xf32>
    %cst_17 = arith.constant dense<0.000000e+00> : vector<8x64xf32>
    %46 = vector.multi_reduction <add>, %45, %cst_17 [1] : vector<8x8x64xf32> to vector<8x64xf32>
    %47 = vector.broadcast %6 : vector<1x64xf32> to vector<8x64xf32>
    %48 = arith.addf %46, %47 : vector<8x64xf32>
    %cst_18 = arith.constant 0.000000e+00 : f32
    %49 = vector.broadcast %cst_18 : f32 to vector<8x64xf32>
    %50 = arith.maximumf %48, %49 : vector<8x64xf32>
    %c112 = arith.constant 112 : index
    %c0_19 = arith.constant 0 : index
    %51 = vector.load %arg3[%c112, %c0_19] : memref<176x128xf32, #tpu.memory_space<vmem>>, vector<64x32xf32>
    %c34 = arith.constant 34 : index
    %c0_20 = arith.constant 0 : index
    %52 = vector.load %arg3[%c34, %c0_20] : memref<176x128xf32, #tpu.memory_space<vmem>>, vector<1x32xf32>
    %c35 = arith.constant 35 : index
    %c0_21 = arith.constant 0 : index
    %53 = vector.load %arg3[%c35, %c0_21] : memref<176x128xf32, #tpu.memory_space<vmem>>, vector<1x16xf32>
    %c36 = arith.constant 36 : index
    %c0_22 = arith.constant 0 : index
    %54 = vector.load %arg3[%c36, %c0_22] : memref<176x128xf32, #tpu.memory_space<vmem>>, vector<1x16xf32>
    %cst_23 = arith.constant dense<0.000000e+00> : vector<8x32xf32>
    %55 = tpu.matmul %50, %51, %cst_23 {dimension_numbers = #tpu.dot_dimension_numbers<[1], [0], [0], [1], [0, 0, 1, 1], [], []>} : vector<8x64xf32>, vector<64x32xf32>, vector<8x32xf32> -> vector<8x32xf32>
    %56 = vector.broadcast %52 : vector<1x32xf32> to vector<8x32xf32>
    %57 = arith.addf %55, %56 : vector<8x32xf32>
    %58 = vector.extract_strided_slice %57 {offsets = [0, 0], sizes = [8, 16], strides = [1, 1]} : vector<8x32xf32> to vector<8x16xf32>
    %59 = vector.extract_strided_slice %57 {offsets = [0, 16], sizes = [8, 16], strides = [1, 1]} : vector<8x32xf32> to vector<8x16xf32>
    %60 = vector.shape_cast %59 : vector<8x16xf32> to vector<8x1x16xf32>
    %61 = vector.shape_cast %58 : vector<8x16xf32> to vector<1x8x16xf32>
    %62 = vector.broadcast %60 : vector<8x1x16xf32> to vector<8x8x16xf32>
    %63 = vector.broadcast %61 : vector<1x8x16xf32> to vector<8x8x16xf32>
    %64 = arith.addf %62, %63 : vector<8x8x16xf32>
    %cst_24 = arith.constant 0.000000e+00 : f32
    %65 = vector.broadcast %cst_24 : f32 to vector<8x8x16xf32>
    %66 = arith.cmpf ogt, %64, %65 : vector<8x8x16xf32>
    %cst_25 = arith.constant 2.000000e-01 : f32
    %67 = vector.broadcast %cst_25 : f32 to vector<8x8x16xf32>
    %68 = arith.mulf %67, %64 : vector<8x8x16xf32>
    %69 = arith.select %66, %64, %68 : vector<8x8x16xi1>, vector<8x8x16xf32>
    %70 = vector.shape_cast %54 : vector<1x16xf32> to vector<1x1x16xf32>
    %71 = vector.broadcast %70 : vector<1x1x16xf32> to vector<8x8x16xf32>
    %72 = arith.mulf %69, %71 : vector<8x8x16xf32>
    %cst_26 = arith.constant dense<0.000000e+00> : vector<8x8xf32>
    %73 = vector.multi_reduction <add>, %72, %cst_26 [2] : vector<8x8x16xf32> to vector<8x8xf32>
    %74 = arith.addf %73, %3 : vector<8x8xf32>
    %cst_27 = arith.constant dense<0xFF800000> : vector<8xf32>
    %75 = vector.multi_reduction <maximumf>, %74, %cst_27 [1] : vector<8x8xf32> to vector<8xf32>
    %76 = vector.shape_cast %75 : vector<8xf32> to vector<8x1xf32>
    %77 = vector.broadcast %76 : vector<8x1xf32> to vector<8x8xf32>
    %78 = arith.subf %74, %77 : vector<8x8xf32>
    %79 = math.exp %78 : vector<8x8xf32>
    %cst_28 = arith.constant dense<0.000000e+00> : vector<8xf32>
    %80 = vector.multi_reduction <add>, %79, %cst_28 [1] : vector<8x8xf32> to vector<8xf32>
    %81 = vector.shape_cast %80 : vector<8xf32> to vector<8x1xf32>
    %82 = tpu.reciprocal %81 {approx = true} : vector<8x1xf32> -> vector<8x1xf32>
    %83 = vector.broadcast %82 : vector<8x1xf32> to vector<8x8xf32>
    %84 = arith.mulf %79, %83 : vector<8x8xf32>
    %cst_29 = arith.constant dense<0.000000e+00> : vector<8x16xf32>
    %85 = tpu.matmul %84, %58, %cst_29 {dimension_numbers = #tpu.dot_dimension_numbers<[1], [0], [0], [1], [0, 0, 1, 1], [], []>} : vector<8x8xf32>, vector<8x16xf32>, vector<8x16xf32> -> vector<8x16xf32>
    %86 = vector.broadcast %53 : vector<1x16xf32> to vector<8x16xf32>
    %87 = arith.addf %85, %86 : vector<8x16xf32>
    %cst_30 = arith.constant 0.000000e+00 : f32
    %88 = vector.broadcast %cst_30 : f32 to vector<8x16xf32>
    %89 = arith.maximumf %87, %88 : vector<8x16xf32>
    %c0_31 = arith.constant 0 : index
    %c0_32 = arith.constant 0 : index
    %c0_33 = arith.constant 0 : index
    %90 = vector.load %arg4[%c0_31, %c0_32, %c0_33] : memref<1x8x16xf32, #tpu.memory_space<vmem>>, vector<1x8x16xf32>
    %91 = vector.shape_cast %90 : vector<1x8x16xf32> to vector<8x16xf32>
    %92 = vector.shape_cast %89 : vector<8x16xf32> to vector<1x8x16xf32>
    tpu.vector_store %arg4[%c0_31, %c0_32, %c0_33], %92 {strides = array<i32>} : memref<1x8x16xf32, #tpu.memory_space<vmem>>, vector<1x8x16xf32>,
    return
  }
  func.func @transform_0(%arg0: i32) -> (i32, i32, i32) {
    %c0_i32 = arith.constant 0 : i32
    %c0_i32_0 = arith.constant 0 : i32
    %c0_i32_1 = arith.constant 0 : i32
    return %arg0, %c0_i32, %c0_i32_0 : i32, i32, i32
  }
  func.func @transform_1(%arg0: i32) -> (i32, i32, i32) {
    %c0_i32 = arith.constant 0 : i32
    %c0_i32_0 = arith.constant 0 : i32
    %c0_i32_1 = arith.constant 0 : i32
    return %arg0, %c0_i32, %c0_i32_0 : i32, i32, i32
  }
  func.func @transform_2(%arg0: i32) -> (i32, i32) {
    %c0_i32 = arith.constant 0 : i32
    %c0_i32_0 = arith.constant 0 : i32
    %c0_i32_1 = arith.constant 0 : i32
    return %c0_i32, %c0_i32_0 : i32, i32
  }
  func.func @transform_3(%arg0: i32) -> (i32, i32, i32) {
    %c0_i32 = arith.constant 0 : i32
    %c0_i32_0 = arith.constant 0 : i32
    %c0_i32_1 = arith.constant 0 : i32
    return %arg0, %c0_i32, %c0_i32_0 : i32, i32, i32
  }
}

</mosaic_0001>

<bundles_post_ra>
// kernel: biogpt_relation_extractor_forward.1
= control target key start
LH: loop header
LB: loop body
LE: loop exit
PB: predicated region body
PF: predicated region fallthrough
CT: control target
= control target key end

     0   :  { %8 = vsyncpa [#allocation3], 0  ;;  %s2932_s0 = inlined_call_operand.hbm [shape: f32[4,8,32], index: 0, kind: input, shape index: {}]   ;;  %s2933_s1 = inlined_call_operand.hbm [shape: f32[4,8,8], index: 1, kind: input, shape index: {}]   ;;  %s2934_s2 = inlined_call_operand.hbm [shape: f32[176,128], index: 2, kind: input, shape index: {}]   ;;  %s2935_s3 = inlined_call_operand.hbm [shape: f32[4,8,16], index: 3, kind: output, shape index: {}]  }
   0x1   :  { %10 = vsyncpa [#allocation3 + $0x1], 0 }
   0x2   :  { %11 = vsyncpa [#allocation6], 0 }
   0x3   :  { %13 = vsyncpa [#allocation6 + $0x1], 0 }
   0x4   :  { %14 = vsyncpa [#allocation4], 0 }
   0x5   :  { %16 = vsyncpa [#allocation4 + $0x1], 0  ;;  %s2429_s12 = smov 0   ;;  %s2431_s13 = smov 0  }
   0x6   :  { %s2433_s14 = smov 0   ;;  %s2435_s15 = smov 0  }
   0x7 LB: > { %s2450_s16 = sadd.s32 4294967295, %s2394_s15   ;;  %s1957_s17 = sadd.s32 4294967294, %s2394_s15   ;;  %s2394_s15 = sphi %s2435_s15, %s2956_s15   ;;  %s2390_s14 = sphi %s2433_s14, %s2955_s14   ;;  %s2386_s13 = sphi %s2431_s13, %s2954_s13   ;;  %s2382_s12 = sphi %s2429_s12, %s2953_s12  }
   0x8   : > { %p42_p0 = scmp.ne.s32.totalorder %s2386_s13, %s2382_s12  ;;  %p2936_p1 = scmp.eq.s32.totalorder %s2450_s16, 0 }
   0x9   : > { %p119_p3 = scmp.eq.s32.totalorder %s1957_s17, 3  ;;  %p1958_p5 = scmp.ge.s32.totalorder %s2394_s15, 1 }
   0xa   : > { %p2459_p4 = por %p2936_p1, %p42_p0  ;;  %p126_p7 = scmp.lt.s32.totalorder %s2394_s15, 5 }
   0xb   : > { %p2464_p6 = por %p119_p3, %p42_p0  ;;  %s2396_s21 = smov [#allocation7]  }
   0xc   : > { %s2940_s18 = scalar_select %p2459_p4, 1, 0 }
   0xd   : > { %s2941_s19 = scalar_select %p2464_p6, 1, 0 }
   0xe   : > { %p2469_p8 = pnand %p1958_p5, %p126_p7  ;;  %s138_s22 = sshll.u32 %s2396_s21, 4  ;;  %s139_s22 = int_to_ptr.vmem [resolvable:$true] %s138_s22 }
   0xf   : > { %s2482_s24 = sadd.s32 1, %s2394_s15   ;;  %s29_s25 = sadd.s32 1, %s2390_s14 }
  0x10   : > { %s2942_s20 = scalar_select %p2469_p8, 1, 0 }
  0x11   : > { %p2127_p9 = pneg %p2469_p8  ;;  %s26_s26 = ssub.s32 %s2394_s15, %s2482_s24 }
  0x12   : > { %s2251_s27 = scalar_lea.vmem %s139_s22, 2816  ;;  %p2259_p3 = scmp.lt.s32.totalorder %s139_s22, %s139_s22 }
  0x13   : > { %p2477_p10 = pnand %p2127_p9, %p2936_p1  ;;  %p2252_p12 = scmp.ne.s32.totalorder %s139_s22, %s2251_s27 }
  0x14   : > { %p2260_p5 = scmp.lt.s32.totalorder %s2251_s27, %s2251_s27 }
  0x15   : > { %p2242_p11 = pneg %p2477_p10 }
  0x16   : > { %p2261_p7 = por %p2260_p5, %p2259_p3 }
  0x17   : > { %p2254_p13 = pnand %p2252_p12, %p2242_p11 }
  0x19   : > { %p2255_p0 = pneg %p2254_p13 }
  0x1b   : > { %p2262_p2 = pnand %p2261_p7, %p2255_p0 }
  0x1d   : > { %2265 = shalt.err (!%p2262_p2)
}
  0x1e   : > { %s2397_s28 = smov 128   ;;  %s2398_s29 = smov 8  }
  0x1f   : > { %2130 = dma.hbm_to_vmem [thread:$0]  (!%p2477_p10), %s2934_s2, 2816, %s139_s22, [#allocation6], %s2397_s28, %s2397_s28, %s2398_s29  }
  0x20   : > { %p27_p9 = scmp.eq.s32.totalorder %s26_s26, 0  ;;  %p36_p11 = scmp.ne.s32.totalorder %s2390_s14, %s2386_s13 }
  0x21   : > { %p37_p12 = scmp.eq.s32.totalorder %s2394_s15, 0  ;;  %p2143_p2 = scmp.lt.s32.totalorder %s2394_s15, 4 }
  0x22   : > { %s2499_s5 = scalar_select %p27_p9, %s2390_s14, %s29_s25  }
  0x23   : > { %p38_p13 = por %p37_p12, %p36_p11  ;;  %p2944_p0 = scmp.eq.s32.totalorder %s2450_s16, 3 }
  0x24   : > { %s152_s7 = sand.u32 1, %s2390_s14   ;;  %s1962_s8 = sshll.u32 %s2394_s15, 7 }
  0x25   : > { %p2503_p3 = por %p2944_p0, %p36_p11  ;;  %s2509_s9 = sshll.u32 %s152_s7, 3 }
  0x26   : > { %s2514_s17 = scalar_lea.hbm %s2932_s0, %s1962_s8  ;;  %s156_s21 = scalar_lea.vmem [#allocation2], %s2509_s9 }
  0x27   : > { %s2945_s6 = scalar_select %p2503_p3, 1, 0 }
  0x28   : > { %s163_s22 = sshll.u32 %s156_s21, 4  ;;  %p2517_p10 = pnand %p2143_p2, %p38_p13  ;;  %s164_s22 = int_to_ptr.vmem [resolvable:$true] %s163_s22 }
  0x29   : > { %s2524_s27 = scalar_lea.hbm %s2933_s1, %s1962_s8  ;;  %s153_s28 = scalar_lea.sflag [#allocation3], %s152_s7 }
  0x2a   : > { %s2266_s29 = scalar_lea.hbm %s2514_s17, 128  ;;  %p2268_p7 = pneg %p2517_p10 }
  0x2b   : > { %p2267_p5 = scmp.ne.s32.totalorder %s2514_s17, %s2266_s29  ;;  %s2271_s10 = scalar_lea.hbm %s2932_s0, 512 }
  0x2c   : > { %p2272_p12 = scmp.lt.s32.totalorder %s2514_s17, %s2932_s0  ;;  %p2273_p2 = scmp.lt.s32.totalorder %s2271_s10, %s2266_s29 }
  0x2d   : > { %p2269_p9 = pnand %p2268_p7, %p2267_p5 }
  0x2e   : > { %p2274_p13 = por %p2273_p2, %p2272_p12 }
  0x2f   : > { %p2270_p11 = pneg %p2269_p9 }
  0x31   : > { %p2275_p0 = pnand %p2274_p13, %p2270_p11 }
  0x33   : > { %2278 = shalt.err (!%p2275_p0)
}
  0x34   : > { %s2279_s7 = scalar_lea.vmem %s164_s22, 128  ;;  %s2399_s8 = smov [#allocation2]  }
  0x35   : > { %p2280_p1 = scmp.ne.s32.totalorder %s164_s22, %s2279_s7  ;;  %s2284_s25 = sshll.u32 %s2399_s8, 4  ;;  %s2285_s25 = int_to_ptr.vmem [resolvable:$false] %s2284_s25 }
  0x36   : > { %s2286_s26 = scalar_lea.vmem %s2285_s25, 256  ;;  %p2287_p9 = scmp.lt.s32.totalorder %s164_s22, %s2285_s25 }
  0x37   : > { %p2282_p6 = pnand %p2280_p1, %p2268_p7  ;;  %p2288_p3 = scmp.lt.s32.totalorder %s2286_s26, %s2279_s7 }
  0x39   : > { %p2283_p5 = pneg %p2282_p6  ;;  %p2289_p4 = por %p2288_p3, %p2287_p9 }
  0x3b   : > { %p2290_p8 = pnand %p2289_p4, %p2283_p5 }
  0x3d   : > { %2293 = shalt.err (!%p2290_p8)
}
  0x3e   : > { %2134 = dma.hbm_to_vmem [thread:$0]  (!%p2517_p10), %s2514_s17, 128, %s164_s22, %s153_s28  }
  0x3f   : > { %s170_s29 = sand.u32 1, %s2394_s15   ;;  %s174_s30 = scalar_lea.vmem [#allocation5], %s2509_s9 }
  0x40   : > { %s181_s4 = sshll.u32 %s174_s30, 4  ;;  %s171_s10 = scalar_lea.sflag [#allocation6], %s170_s29  ;;  %s182_s4 = int_to_ptr.vmem [resolvable:$true] %s181_s4 }
  0x41   : > { %s2294_s11 = scalar_lea.hbm %s2524_s27, 128  ;;  %s2299_s8 = scalar_lea.hbm %s2933_s1, 512 }
  0x42   : > { %p2295_p1 = scmp.ne.s32.totalorder %s2524_s27, %s2294_s11  ;;  %p2300_p8 = scmp.lt.s32.totalorder %s2524_s27, %s2933_s1 }
  0x43   : > { %p2301_p3 = scmp.lt.s32.totalorder %s2299_s8, %s2294_s11 }
  0x44   : > { %p2297_p4 = pnand %p2295_p1, %p2268_p7 }
  0x45   : > { %p2302_p11 = por %p2301_p3, %p2300_p8 }
  0x46   : > { %p2298_p6 = pneg %p2297_p4 }
  0x48   : > { %p2303_p12 = pnand %p2302_p11, %p2298_p6 }
  0x4a   : > { %2306 = shalt.err (!%p2303_p12)
}
  0x4b   : > { %s2307_s9 = scalar_lea.vmem %s182_s4, 128  ;;  %s2400_s17 = smov [#allocation5]  }
  0x4c   : > { %p2308_p2 = scmp.ne.s32.totalorder %s182_s4, %s2307_s9  ;;  %s2312_s22 = sshll.u32 %s2400_s17, 4  ;;  %s2313_s22 = int_to_ptr.vmem [resolvable:$false] %s2312_s22 }
  0x4d   : > { %s2314_s28 = scalar_lea.vmem %s2313_s22, 256  ;;  %p2315_p5 = scmp.lt.s32.totalorder %s182_s4, %s2313_s22 }
  0x4e   : > { %p2310_p13 = pnand %p2308_p2, %p2268_p7  ;;  %p2316_p9 = scmp.lt.s32.totalorder %s2314_s28, %s2307_s9 }
  0x50   : > { %p2311_p0 = pneg %p2310_p13  ;;  %p2317_p1 = por %p2316_p9, %p2315_p5 }
  0x52   : > { %p2318_p4 = pnand %p2317_p1, %p2311_p0 }
  0x54   : > { %2321 = shalt.err (!%p2318_p4)
}
  0x55   : > { %2137 = dma.hbm_to_vmem [thread:$0]  (!%p2517_p10), %s2524_s27, 128, %s182_s4, %s171_s10  }
  0x56   : > { %p2947_p6 = scmp.ne.s32.totalorder %s2942_s20, 0 }
  0x57   : > { %s2569_s29 = sand.u32 (!%p2947_p6), 1, %s2386_s13   ;;  %p2948_p7 = scmp.ne.s32.totalorder (!%p2947_p6), %s2940_s18, 0 }
  0x58   : > { %190 = sbr.rel (%p2947_p6) target bundleno = 2579 (0xa13), region = 32  ;;  %s2572_s30 = sshll.u32 (!%p2947_p6), %s2569_s29, 3 }
  0x59   : > { %s193_s11 = scalar_lea.sflag (!%p2947_p6), [#allocation3], %s2569_s29  ;;  %s196_s21 = scalar_lea.vmem (!%p2947_p6), [#allocation2], %s2572_s30 }
  0x5d   : > { %2365 = dma.done.wait (%p2948_p7), %s193_s11, 128  }
  0x5e   : > { %2367 = vsyncadd (%p2948_p7), %s193_s11, 4294967168  ;;  %s201_s20 = sand.u32 1, %s2450_s16   ;;  %s205_s27 = scalar_lea.vmem [#allocation5], %s2572_s30 }
  0x5f   : > { %s202_s23 = scalar_lea.sflag [#allocation6], %s201_s20 }
  0x60   : > { %2369 = dma.done.wait (%p2948_p7), %s202_s23, 128  }
  0x61   : > { %2371 = vsyncadd (%p2948_p7), %s202_s23, 4294967168  ;;  %p2949_p10 = scmp.eq.s32.totalorder %s2450_s16, 0 }
  0x63   : > { %2373 = dma.done.wait (%p2949_p10), [#allocation6], 2816   ;;  %p2950_p8 = pmov %p2949_p10 }
  0x64   : > { %v2401_v0 = vmov 0.0   ;;  %vm2402_vm0 = vmmov 0   ;;  %v242_v1 = vld [vmem:[#allocation7 + $0x18] sm:$0xff]  ;;  %v241_v2 = vld [vmem:[#allocation7 + $0x10] sm:$0xff]  ;;  %v240_v3 = vld [vmem:[#allocation7 + $0x8] sm:$0xff]  ;;  %vm258_vm1 = vcmask 261120   ;;  %v337_v20 = vlaneseq }
  0x65   : > { %2375 = vsyncadd (%p2950_p8), [#allocation6], 4294964480  ;;  %2040 = vmatprep.subr.mxu0 %v2401_v0  ;;  %2048 = vmatprep.mubr.msk.f32.mxu0 %vm2402_vm0, %v2401_v0  ;;  %v239_v4 = vld [vmem:[#allocation7] sm:$0xff]  ;;  %s2403_s18 = smov 64   ;;  %v253_v10 = vld [vmem:[#allocation7 + $0x68] sm:$0xff]  ;;  %vm481_vm10 = vcmask 523264  }
  0x66   : > { %2041 = vmatpush3.msra.mxu0 %v242_v1  ;;  %v237_v5 = vld [vmem:[%s196_s21] sm:$0xff]  ;;  %2051 = vmatprep.subr.mxu1 %v253_v10  ;;  %v251_v12 = vld [vmem:[#allocation7 + $0x58] sm:$0xff]  ;;  %v250_v13 = vld [vmem:[#allocation7 + $0x50] sm:$0xff]  ;;  %v2404_v18 = vmov 1966171168   ;;  %v2601_v22 = vshrl.u32 %v337_v20, 7 }
  0x67   : > { %2042 = vmatprep.subr.mxu0 %v2401_v0  ;;  %v1970_v6 = vld [vmem:[#allocation7 + $0x20] ss:$0 sm:$0xff]  ;;  %2052 = vmatpush3.msra.mxu1 %v253_v10  ;;  %v249_v14 = vld [vmem:[#allocation7 + $0x48] sm:$0xff]  ;;  %v247_v16 = vld [vmem:[#allocation7 + $0x38] sm:$0xff]  ;;  %v335_v19 = vunpack.c.l.s4 %v2404_v18  ;;  %vm844_vm11 = vcmask 1043456   ;;  %vm667_vm12 = vcmask 31744  }
  0x68   : > { %2043 = vmatpush3.msra.mxu0 %v241_v2  ;;  %v252_v11 = vld [vmem:[#allocation7 + $0x60] sm:$0xff]  ;;  %v246_v17 = vld [vmem:[#allocation7 + $0x30] sm:$0xff]  ;;  %v2614_v31 = vsub.s32 0, %v2601_v22  ;;  %v2663_v18 = vsub.s32 4, %v2601_v22  ;;  %vm1061_vm13 = vcmask 1041409   ;;  %vm1064_vm14 = vcmask 1042434  }
  0x69   : > { %2044 = vmatprep.subr.mxu0 %v2401_v0  ;;  %2053 = vmatprep.subr.mxu1 %v252_v11  ;;  %v248_v15 = vld [vmem:[#allocation7 + $0x40] sm:$0xff]  ;;  %v336_v21 = vunpack.c.0.s8 %v335_v19  ;;  %vm1067_vm15 = vcmask 1043459   ;;  %s2405_s4 = smov 16   ;;  %s2406_s10 = smov 112  }
  0x6a   : > { %2045 = vmatpush3.msra.mxu0 %v240_v3  ;;  %2054 = vmatpush3.msra.mxu1 %v252_v11  ;;  %s1996_s7 = sshll.u32 %s2450_s16, 7  ;;  %s236_s8 = scalar_lea.vmem [#allocation8], %s2572_s30 }
  0x6b   : > { %2046 = vmatprep.subr.mxu0 %v2401_v0  ;;  %2055 = vmatprep.subr.mxu1 %v251_v12  ;;  %v2604_v23 = vsub.s32 %v336_v21, %v2601_v22  ;;  %s1855_s25 = sshll.u32 %s236_s8, 4  ;;  %s1853_s17 = scalar_lea.hbm %s2935_s3, %s1996_s7  ;;  %s1856_s25 = int_to_ptr.vmem [resolvable:$true] %s1855_s25 }
  0x6c   : > { %2047 = vmatpush3.msra.mxu0 %v239_v4  ;;  %2056 = vmatpush3.msra.mxu1 %v251_v12  ;;  %s1842_s22 = scalar_lea.sflag [#allocation4], %s2569_s29  ;;  %s2322_s28 = scalar_lea.vmem %s1856_s25, 128 }
  0x6d   : > { %2049 = vmatmul.mubr.msk.f32.vlgmr.msra.gmra.mxu0 %vm258_vm1, %v237_v5  ;;  %2057 = vmatprep.subr.mxu1 %v250_v13  ;;  %vm1070_vm1 = vcmask 1044484   ;;  %p2323_p3 = scmp.ne.s32.totalorder %s1856_s25, %s2322_s28  ;;  %p2951_p11 = scmp.ne.s32.totalorder %s2945_s6, 0 }
  0x6e   : > { %2058 = vmatpush3.msra.mxu1 %v250_v13  ;;  %v2646_v13 = vsub.s32 3, %v2601_v22  ;;  %s2408_s11 = smov [#allocation8]  }
  0x6f   : > { %2059 = vmatprep.subr.mxu1 %v249_v14  ;;  %p2324_p12 = pnand %p2323_p3, %p2951_p11  ;;  %s2326_s16 = sshll.u32 %s2408_s11, 4  ;;  %s2327_s16 = int_to_ptr.vmem [resolvable:$false] %s2326_s16 }
  0x70   : > { %2060 = vmatpush3.msra.mxu1 %v249_v14  ;;  %v2649_v14 = vsub.s32 2, %v2601_v22  ;;  %s2328_s30 = scalar_lea.vmem %s2327_s16, 256  ;;  %p2329_p13 = scmp.lt.s32.totalorder %s1856_s25, %s2327_s16 }
  0x71   : > { %2061 = vmatprep.subr.mxu1 %v248_v15  ;;  %p2325_p2 = pneg %p2324_p12  ;;  %p2330_p0 = scmp.lt.s32.totalorder %s2328_s30, %s2322_s28 }
  0x72   : > { %2062 = vmatpush3.msra.mxu1 %v248_v15 }
  0x73   : > { %2063 = vmatprep.subr.mxu1 %v247_v16  ;;  %p2331_p5 = por %p2330_p0, %p2329_p13 }
  0x74   : > { %2064 = vmatpush3.msra.mxu1 %v247_v16 }
  0x75   : > { %2065 = vmatprep.subr.mxu1 %v246_v17  ;;  %p2332_p9 = pnand %p2331_p5, %p2325_p2 }
  0x76   : > { %2066 = vmatpush3.msra.mxu1 %v246_v17  ;;  %v2660_v17 = vsub.s32 5, %v2601_v22 }
 0x12d   : > { %v328_v7 = vpop.f32.mrf.mxu0 }
 0x12e   : > { %v2596_v8 = vadd.f32 %v1970_v6, %v328_v7  ;;  %v2633_v6 = vsub.s32 1, %v2601_v22  ;;  %v238_v7 = vld [vmem:[%s205_s27] sm:$0xff] }
 0x12f   : > { %v2050_v9 = vpop.f32.mrf.mxu0  ;;  %v2643_v12 = vrot.slane %v238_v7, %v2614_v31  ;;  %v2654_v15 = vrot.slane %v238_v7, %v2646_v13  ;;  %v2657_v16 = vrot.slane %v238_v7, %v2649_v14  ;;  %v2668_v19 = vrot.slane %v238_v7, %v2660_v17 }
 0x130   : > { %422 = vrot.lane.b32.xlu0 %v2596_v8, %s2403_s18  ;;  %v340_v24 = vrot.slane %v2596_v8, %v2604_v23  ;;  %v333_v25 = vcombine.high %v2596_v8, %v2596_v8  ;;  %v2640_v11 = vrot.slane %v238_v7, %v2633_v6  ;;  %v2671_v21 = vrot.slane %v238_v7, %v2663_v18 }
 0x132   : > { %v348_v26 = vcombine.high %v340_v24, %v340_v24  ;;  %v347_v27 = vrot.slane %v333_v25, %v2604_v23  ;;  %v356_v28 = vrot.slane %v340_v24, %v2604_v23  ;;  %v2674_v24 = vsub.s32 7, %v2601_v22 }
 0x133   : > { %v2677_v25 = vsub.s32 6, %v2601_v22 }
 0x134   : > { %v370_v29 = vrot.slane %v348_v26, %v2604_v23  ;;  %v349_v30 = vcombine.high %v347_v27, %v347_v27  ;;  %v378_v32 = vcombine.high %v356_v28, %v356_v28  ;;  %v363_v34 = vrot.slane %v347_v27, %v2604_v23 }
 0x135   : > { %v385_v36 = vrot.slane %v356_v28, %v2614_v31  ;;  %v2682_v26 = vrot.slane %v238_v7, %v2674_v24  ;;  %v2685_v27 = vrot.slane %v238_v7, %v2677_v25 }
 0x136   : > { %v380_v33 = vcombine.high %v370_v29, %v370_v29  ;;  %v377_v35 = vrot.slane %v349_v30, %v2604_v23  ;;  %v389_v37 = vrot.slane %v370_v29, %v2614_v31  ;;  %v393_v38 = vrot.slane %v378_v32, %v2614_v31 }
 0x137   : > { %v401_v45 = vrot.slane %v363_v34, %v2614_v31  ;;  %v379_v47 = vcombine.high %v363_v34, %v363_v34 }
 0x138   : > { %v397_v39 = vrot.slane %v380_v33, %v2614_v31  ;;  %v405_v46 = vrot.slane %v377_v35, %v2614_v31  ;;  %v381_v48 = vcombine.high %v377_v35, %v377_v35 }
 0x139   : > { %v409_v57 = vrot.slane %v379_v47, %v2614_v31 }
 0x13a   : > { %v413_v58 = vrot.slane %v381_v48, %v2614_v31 }
 0x1a2   : > { %v423_v40 = vpop.permute.xlu0 %422 }
 0x1a3   : > { %v425_v41 = vadd.f32 %v423_v40, %v385_v36  ;;  %v426_v42 = vadd.f32 %v423_v40, %v389_v37  ;;  %v427_v43 = vadd.f32 %v423_v40, %v393_v38  ;;  %v428_v44 = vadd.f32 %v423_v40, %v397_v39  ;;  %v245_v37 = vld [vmem:[#allocation7 + $0x28] sm:$0xf] }
 0x1a4   : > { %v429_v51 = vadd.f32 %v423_v40, %v401_v45  ;;  %v430_v52 = vadd.f32 %v423_v40, %v405_v46  ;;  %v431_v59 = vadd.f32 %v423_v40, %v409_v57  ;;  %v432_v60 = vadd.f32 %v423_v40, %v413_v58  ;;  %2079 = vmatprep.subr.msk.mxu0 %vm844_vm11, %v245_v37 }
 0x1a5   : > { %vm433_vm2 = vcmp.gt.f32.partialorder %v425_v41, 0.0  ;;  %v441_v49 = vmul.f32 0.2, %v425_v41  ;;  %vm434_vm3 = vcmp.gt.f32.partialorder %v426_v42, 0.0  ;;  %v442_v50 = vmul.f32 0.2, %v426_v42  ;;  %2080 = vmatpush3.msk.msra.mxu0 %vm844_vm11, %v245_v37 }
 0x1a6   : > { %v443_v55 = vmul.f32 0.2, %v427_v43  ;;  %v444_v56 = vmul.f32 0.2, %v428_v44  ;;  %vm435_vm4 = vcmp.gt.f32.partialorder %v427_v43, 0.0  ;;  %vm436_vm5 = vcmp.gt.f32.partialorder %v428_v44, 0.0  ;;  %2093 = vmatprep.subr.mxu0 %v2401_v0 }
 0x1a7   : > { %v449_v53 = vsel %vm433_vm2, %v425_v41, %v441_v49  ;;  %v450_v54 = vsel %vm434_vm3, %v426_v42, %v442_v50  ;;  %v445_v63 = vmul.f32 0.2, %v429_v51  ;;  %v446_v1 = vmul.f32 0.2, %v430_v52 }
 0x1a8   : > { %465 = vrot.lane.b32.xlu0 %v449_v53, %s2403_s18  ;;  %467 = vrot.lane.b32.xlu1 %v450_v54, %s2403_s18  ;;  %v451_v61 = vsel %vm435_vm4, %v427_v43, %v443_v55  ;;  %v452_v62 = vsel %vm436_vm5, %v428_v44, %v444_v56  ;;  %vm437_vm6 = vcmp.gt.f32.partialorder %v429_v51, 0.0  ;;  %vm438_vm7 = vcmp.gt.f32.partialorder %v430_v52, 0.0 }
 0x1a9   : > { %v453_v2 = vsel %vm437_vm6, %v429_v51, %v445_v63  ;;  %v454_v3 = vsel %vm438_vm7, %v430_v52, %v446_v1  ;;  %v447_v4 = vmul.f32 0.2, %v431_v59  ;;  %v448_v5 = vmul.f32 0.2, %v432_v60 }
 0x1aa   : > { %vm439_vm8 = vcmp.gt.f32.partialorder %v431_v59, 0.0  ;;  %vm440_vm9 = vcmp.gt.f32.partialorder %v432_v60, 0.0  ;;  %vm1073_vm2 = vcmask 1045509   ;;  %vm1076_vm3 = vcmask 1046534  }
 0x1ab   : > { %v455_v9 = vsel %vm439_vm8, %v431_v59, %v447_v4  ;;  %v456_v10 = vsel %vm440_vm9, %v432_v60, %v448_v5  ;;  %vm1079_vm4 = vcmask 1047559  }
 0x1ac   : > { %469 = vrot.lane.b32.xlu1 %v451_v61, %s2403_s18  ;;  %471 = vrot.lane.b32.xlu0 %v452_v62, %s2403_s18 }
 0x1b0   : > { %473 = vrot.lane.b32.xlu1 %v453_v2, %s2403_s18  ;;  %475 = vrot.lane.b32.xlu0 %v454_v3, %s2403_s18 }
 0x1b4   : > { %477 = vrot.lane.b32.xlu1 %v455_v9, %s2403_s18  ;;  %479 = vrot.lane.b32.xlu0 %v456_v10, %s2403_s18 }
 0x1b8   : > { %615 = vbcast.lane.b32.xlu0 %v2640_v11, 256  ;;  %608 = vbcast.lane.b32.xlu1 %v2643_v12, 256 }
 0x1bc   : > { %629 = vbcast.lane.b32.xlu0 %v2654_v15, 256  ;;  %622 = vbcast.lane.b32.xlu1 %v2657_v16, 256 }
 0x1c0   : > { %643 = vbcast.lane.b32.xlu0 %v2668_v19, 256  ;;  %636 = vbcast.lane.b32.xlu1 %v2671_v21, 256 }
 0x1c4   : > { %657 = vbcast.lane.b32.xlu0 %v2682_v26, 256  ;;  %650 = vbcast.lane.b32.xlu1 %v2685_v27, 256 }
 0x21a   : > { %v466_v28 = vpop.permute.xlu0 %465  ;;  %v468_v29 = vpop.permute.xlu1 %467 }
 0x21b   : > { %2067 = vmatprep.mubr.msk.f32.mxu1 %vm481_vm10, %v466_v28 }
 0x21c   : > { %2068 = vmatmul.mubr.msk.f32.vlgmr.msra.gmra.mxu1 %vm481_vm10, %v468_v29 }
 0x21e   : > { %v470_v30 = vpop.permute.xlu1 %469  ;;  %v472_v32 = vpop.permute.xlu0 %471 }
 0x21f   : > { %2070 = vmatprep.mubr.msk.f32.mxu1 %vm481_vm10, %v470_v30 }
 0x220   : > { %2071 = vmatmul.mubr.msk.f32.gmra.mxu1 %vm481_vm10, %v472_v32 }
 0x222   : > { %v474_v33 = vpop.permute.xlu1 %473  ;;  %v476_v34 = vpop.permute.xlu0 %475 }
 0x223   : > { %2073 = vmatprep.mubr.msk.f32.mxu1 %vm481_vm10, %v474_v33 }
 0x224   : > { %2074 = vmatmul.mubr.msk.f32.gmra.mxu1 %vm481_vm10, %v476_v34 }
 0x226   : > { %v478_v35 = vpop.permute.xlu1 %477  ;;  %v480_v36 = vpop.permute.xlu0 %479 }
 0x227   : > { %2076 = vmatprep.mubr.msk.f32.mxu1 %vm481_vm10, %v478_v35 }
 0x228   : > { %2077 = vmatmul.mubr.msk.f32.gmra.mxu1 %vm481_vm10, %v480_v36 }
 0x22a   : > { %v616_v38 = vpop.permute.xlu0 %615  ;;  %v609_v39 = vpop.permute.xlu1 %608 }
 0x22e   : > { %v630_v40 = vpop.permute.xlu0 %629  ;;  %v623_v42 = vpop.permute.xlu1 %622 }
 0x232   : > { %v644_v49 = vpop.permute.xlu0 %643  ;;  %v637_v55 = vpop.permute.xlu1 %636 }
 0x236   : > { %v658_v7 = vpop.permute.xlu0 %657  ;;  %v651_v34 = vpop.permute.xlu1 %650 }
 0x2dc   : > { %v2069_v41 = vpop.f32.mrf.mxu1 }
 0x2dd   : > { %v660_v43 = vadd.f32 %v2069_v41, %v616_v38 }
 0x2de   : > { %v564_v44 = vpop.f32.mrf.mxu1 }
 0x2df   : > { %v675_v45 = vsel %vm667_vm12, %v660_v43, -inf  ;;  %v659_v46 = vadd.f32 %v609_v39, %v564_v44 }
 0x2e0   : > { %v676_v47 = vrot.slane %v675_v45, 4  ;;  %v2072_v48 = vpop.f32.mrf.mxu1 }
 0x2e1   : > { %v668_v50 = vsel %vm667_vm12, %v659_v46, -inf  ;;  %v2700_v51 = vadd.f32 %v2072_v48, %v630_v40 }
 0x2e2   : > { %v677_v52 = vmax.f32 %v675_v45, %v676_v47  ;;  %v669_v53 = vrot.slane %v668_v50, 4  ;;  %v574_v54 = vpop.f32.mrf.mxu1 }
 0x2e3   : > { %v689_v56 = vsel %vm667_vm12, %v2700_v51, -inf  ;;  %v2704_v57 = vadd.f32 %v623_v42, %v574_v54 }
 0x2e4   : > { %v678_v58 = vrot.slane %v677_v52, 2  ;;  %v670_v59 = vmax.f32 %v668_v50, %v669_v53  ;;  %v690_v60 = vrot.slane %v689_v56, 4  ;;  %v2075_v61 = vpop.f32.mrf.mxu1 }
 0x2e5   : > { %v682_v62 = vsel %vm667_vm12, %v2704_v57, -inf  ;;  %v2708_v63 = vadd.f32 %v2075_v61, %v644_v49 }
 0x2e6   : > { %v679_v1 = vmax.f32 %v677_v52, %v678_v58  ;;  %v671_v2 = vrot.slane %v670_v59, 2  ;;  %v691_v3 = vmax.f32 %v689_v56, %v690_v60  ;;  %v683_v4 = vrot.slane %v682_v62, 4  ;;  %v584_v5 = vpop.f32.mrf.mxu1 }
 0x2e7   : > { %v703_v9 = vsel %vm667_vm12, %v2708_v63, -inf  ;;  %v663_v10 = vadd.f32 %v637_v55, %v584_v5 }
 0x2e8   : > { %v680_v28 = vrot.slane %v679_v1, 1  ;;  %v672_v29 = vmax.f32 %v670_v59, %v671_v2  ;;  %v692_v30 = vrot.slane %v691_v3, 2  ;;  %v684_v32 = vmax.f32 %v682_v62, %v683_v4  ;;  %v2078_v33 = vpop.f32.mrf.mxu1 }
 0x2e9   : > { %v704_v35 = vrot.slane %v703_v9, 4  ;;  %v696_v36 = vsel %vm667_vm12, %v663_v10, -inf  ;;  %v666_v37 = vadd.f32 %v2078_v33, %v658_v7 }
 0x2ea   : > { %v681_v38 = vmax.f32 %v679_v1, %v680_v28  ;;  %v673_v39 = vrot.slane %v672_v29, 1  ;;  %v693_v40 = vmax.f32 %v691_v3, %v692_v30  ;;  %v685_v41 = vrot.slane %v684_v32, 2  ;;  %v594_v42 = vpop.f32.mrf.mxu1 }
 0x2eb   : > { %v705_v44 = vmax.f32 %v703_v9, %v704_v35  ;;  %v697_v45 = vrot.slane %v696_v36, 4  ;;  %v717_v47 = vsel %vm667_vm12, %v666_v37, -inf  ;;  %v665_v48 = vadd.f32 %v651_v34, %v594_v42 }
 0x2ec   : > { %v725_v49 = vsub.f32 %v660_v43, %v681_v38  ;;  %v674_v50 = vmax.f32 %v672_v29, %v673_v39  ;;  %v694_v52 = vrot.slane %v693_v40, 1  ;;  %v686_v53 = vmax.f32 %v684_v32, %v685_v41 }
 0x2ed   : > { %v706_v54 = vrot.slane %v705_v44, 2  ;;  %v698_v55 = vmax.f32 %v696_v36, %v697_v45  ;;  %v718_v56 = vrot.slane %v717_v47, 4  ;;  %v710_v58 = vsel %vm667_vm12, %v665_v48, -inf }
 0x2ee   : > { %v734_v59 = vmul.f32 1.442695, %v725_v49  ;;  %v724_v60 = vsub.f32 %v659_v46, %v674_v50  ;;  %v695_v61 = vmax.f32 %v693_v40, %v694_v52  ;;  %v687_v62 = vrot.slane %v686_v53, 1 }
 0x2ef   : > { %v707_v1 = vmax.f32 %v705_v44, %v706_v54  ;;  %v699_v2 = vrot.slane %v698_v55, 2  ;;  %v719_v3 = vmax.f32 %v717_v47, %v718_v56  ;;  %v711_v4 = vrot.slane %v710_v58, 4 }
 0x2f0   : > { %2190 = vpow2.f32 %v734_v59  ;;  %v732_v5 = vmul.f32 1.442695, %v724_v60  ;;  %v727_v43 = vsub.f32 %v2700_v51, %v695_v61  ;;  %v688_v7 = vmax.f32 %v686_v53, %v687_v62 }
 0x2f1   : > { %v708_v9 = vrot.slane %v707_v1, 1  ;;  %v700_v28 = vmax.f32 %v698_v55, %v699_v2  ;;  %v720_v29 = vrot.slane %v719_v3, 2  ;;  %v712_v30 = vmax.f32 %v710_v58, %v711_v4 }
 0x2f2   : > { %2192 = vpow2.f32 %v732_v5  ;;  %v738_v32 = vmul.f32 1.442695, %v727_v43  ;;  %v726_v33 = vsub.f32 %v2704_v57, %v688_v7 }
 0x2f3   : > { %v709_v46 = vmax.f32 %v707_v1, %v708_v9  ;;  %v701_v34 = vrot.slane %v700_v28, 1  ;;  %v721_v35 = vmax.f32 %v719_v3, %v720_v29  ;;  %v713_v36 = vrot.slane %v712_v30, 2 }
 0x2f4   : > { %2194 = vpow2.f32 %v738_v32  ;;  %v736_v38 = vmul.f32 1.442695, %v726_v33 }
 0x2f5   : > { %v729_v39 = vsub.f32 %v2708_v63, %v709_v46  ;;  %v702_v40 = vmax.f32 %v700_v28, %v701_v34  ;;  %v722_v41 = vrot.slane %v721_v35, 1  ;;  %v714_v51 = vmax.f32 %v712_v30, %v713_v36 }
 0x2f6   : > { %2196 = vpow2.f32 %v736_v38 }
 0x2f7   : > { %v742_v42 = vmul.f32 1.442695, %v729_v39  ;;  %v728_v44 = vsub.f32 %v663_v10, %v702_v40  ;;  %v723_v45 = vmax.f32 %v721_v35, %v722_v41  ;;  %v715_v47 = vrot.slane %v714_v51, 1 }
 0x2f9   : > { %2198 = vpow2.f32 %v742_v42  ;;  %v740_v49 = vmul.f32 1.442695, %v728_v44  ;;  %v731_v50 = vsub.f32 %v666_v37, %v723_v45  ;;  %v716_v57 = vmax.f32 %v714_v51, %v715_v47 }
 0x2fb   : > { %2200 = vpow2.f32 %v740_v49  ;;  %v746_v52 = vmul.f32 1.442695, %v731_v50  ;;  %v730_v53 = vsub.f32 %v665_v48, %v716_v57 }
 0x2fd   : > { %v2718_v54 = vpop.eup %2190  ;;  %2202 = vpow2.f32 %v746_v52  ;;  %v744_v55 = vmul.f32 1.442695, %v730_v53 }
 0x2fe   : > { %v755_v63 = vsel %vm667_vm12, %v2718_v54, 0.0 }
 0x2ff   : > { %v2722_v56 = vpop.eup %2192  ;;  %v756_v58 = vrot.slane %v755_v63, 4  ;;  %2204 = vpow2.f32 %v744_v55 }
 0x300   : > { %v748_v10 = vsel %vm667_vm12, %v2722_v56, 0.0 }
 0x301   : > { %v2726_v59 = vpop.eup %2194  ;;  %v757_v37 = vadd.f32 %v756_v58, %v755_v63  ;;  %v749_v60 = vrot.slane %v748_v10, 4 }
 0x302   : > { %v769_v48 = vsel %vm667_vm12, %v2726_v59, 0.0 }
 0x303   : > { %v2730_v61 = vpop.eup %2196  ;;  %v758_v62 = vrot.slane %v757_v37, 2  ;;  %v750_v1 = vadd.f32 %v749_v60, %v748_v10  ;;  %v770_v2 = vrot.slane %v769_v48, 4 }
 0x304   : > { %v762_v3 = vsel %vm667_vm12, %v2730_v61, 0.0 }
 0x305   : > { %v759_v4 = vadd.f32 %v758_v62, %v757_v37  ;;  %v751_v5 = vrot.slane %v750_v1, 2  ;;  %v771_v43 = vadd.f32 %v770_v2, %v769_v48  ;;  %v763_v7 = vrot.slane %v762_v3, 4 }
 0x306   : > { %v2734_v9 = vpop.eup %2198 }
 0x307   : > { %v760_v28 = vrot.slane %v759_v4, 1  ;;  %v752_v29 = vadd.f32 %v751_v5, %v750_v1  ;;  %v772_v30 = vrot.slane %v771_v43, 2  ;;  %v764_v32 = vadd.f32 %v763_v7, %v762_v3 }
 0x308   : > { %v2736_v33 = vpop.eup %2200  ;;  %v783_v46 = vsel %vm667_vm12, %v2734_v9, 0.0 }
 0x309   : > { %v761_v34 = vadd.f32 %v760_v28, %v759_v4  ;;  %v753_v35 = vrot.slane %v752_v29, 1  ;;  %v773_v36 = vadd.f32 %v772_v30, %v771_v43  ;;  %v765_v38 = vrot.slane %v764_v32, 2 }
 0x30a   : > { %v2740_v39 = vpop.eup %2202  ;;  %v784_v40 = vrot.slane %v783_v46, 4  ;;  %v776_v41 = vsel %vm667_vm12, %v2736_v33, 0.0 }
 0x30b   : > { %v774_v51 = vrot.slane %v773_v36, 1  ;;  %v766_v42 = vadd.f32 %v765_v38, %v764_v32  ;;  %v777_v44 = vrot.slane %v776_v41, 4  ;;  %2206 = vrcp.f32 %v761_v34 }
 0x30c   : > { %v2205_v45 = vpop.eup %2204  ;;  %v785_v47 = vadd.f32 %v784_v40, %v783_v46  ;;  %v797_v49 = vsel %vm667_vm12, %v2740_v39, 0.0  ;;  %v754_v50 = vadd.f32 %v753_v35, %v752_v29 }
 0x30d   : > { %v767_v57 = vrot.slane %v766_v42, 1  ;;  %v778_v52 = vadd.f32 %v777_v44, %v776_v41  ;;  %v798_v53 = vrot.slane %v797_v49, 4  ;;  %v790_v55 = vsel %vm667_vm12, %v2205_v45, 0.0 }
 0x30e   : > { %v786_v63 = vrot.slane %v785_v47, 2  ;;  %v791_v58 = vrot.slane %v790_v55, 4  ;;  %2208 = vrcp.f32 %v754_v50  ;;  %v775_v10 = vadd.f32 %v774_v51, %v773_v36 }
 0x30f   : > { %v779_v37 = vrot.slane %v778_v52, 2  ;;  %v799_v60 = vadd.f32 %v798_v53, %v797_v49  ;;  %v768_v48 = vadd.f32 %v767_v57, %v766_v42 }
 0x310   : > { %v787_v62 = vadd.f32 %v786_v63, %v785_v47  ;;  %v792_v1 = vadd.f32 %v791_v58, %v790_v55  ;;  %2210 = vrcp.f32 %v775_v10  ;;  %v1039_v55 = vld [vmem:[#allocation7 + $0x80] sm:$0xff]  ;;  %v1038_v63 = vld [vmem:[#allocation7 + $0x78] sm:$0xff]  ;;  %v1037_v58 = vld [vmem:[#allocation7 + $0x70] sm:$0xff] }
 0x311   : > { %v780_v2 = vadd.f32 %v779_v37, %v778_v52  ;;  %v800_v3 = vrot.slane %v799_v60, 2  ;;  %2212 = vrcp.f32 %v768_v48 }
 0x312   : > { %v788_v4 = vrot.slane %v787_v62, 1  ;;  %v793_v5 = vrot.slane %v792_v1, 2 }
 0x313   : > { %v781_v43 = vrot.slane %v780_v2, 1  ;;  %v801_v7 = vadd.f32 %v800_v3, %v799_v60 }
 0x314   : > { %v794_v28 = vadd.f32 %v793_v5, %v792_v1  ;;  %v789_v29 = vadd.f32 %v788_v4, %v787_v62 }
 0x315   : > { %v802_v30 = vrot.slane %v801_v7, 1  ;;  %v782_v32 = vadd.f32 %v781_v43, %v780_v2 }
 0x316   : > { %v795_v46 = vrot.slane %v794_v28, 1  ;;  %2214 = vrcp.f32 %v789_v29 }
 0x317   : > { %2216 = vrcp.f32 %v782_v32  ;;  %v803_v34 = vadd.f32 %v802_v30, %v801_v7 }
 0x318   : > { %v796_v35 = vadd.f32 %v795_v46, %v794_v28  ;;  %v2207_v36 = vpop.eup %2206 }
 0x319   : > { %2218 = vrcp.f32 %v803_v34  ;;  %v813_v51 = vmul.f32 %v2207_v36, %v2718_v54 }
 0x31a   : > { %2220 = vrcp.f32 %v796_v35 }
 0x31b   : > { %v2209_v38 = vpop.eup %2208 }
 0x31c   : > { %v812_v40 = vmul.f32 %v2209_v38, %v2722_v56 }
 0x31d   : > { %v2211_v41 = vpop.eup %2210 }
 0x31e   : > { %v2213_v42 = vpop.eup %2212  ;;  %2081 = vmatprep.mubr.msk.f32.mxu0 %vm667_vm12, %v812_v40  ;;  %v815_v47 = vmul.f32 %v2211_v41, %v2726_v59  ;;  %v1044_v59 = vld [vmem:[#allocation7 + $0xa8] sm:$0xff] }
 0x31f   : > { %2082 = vmatmul.mubr.msk.f32.vlgmr.msra.gmra.mxu0 %vm667_vm12, %v813_v51  ;;  %v814_v44 = vmul.f32 %v2213_v42, %v2730_v61 }
 0x320   : > { %2094 = vmatpush3.msra.mxu0 %v1044_v59 }
 0x321   : > { %2084 = vmatprep.mubr.msk.f32.mxu0 %vm667_vm12, %v814_v44  ;;  %2095 = vmatprep.subr.mxu0 %v2401_v0 }
 0x323   : > { %v2215_v49 = vpop.eup %2214  ;;  %2085 = vmatmul.mubr.msk.f32.gmra.mxu0 %vm667_vm12, %v815_v47 }
 0x324   : > { %v2217_v50 = vpop.eup %2216  ;;  %v817_v54 = vmul.f32 %v2215_v49, %v2734_v9  ;;  %v1043_v9 = vld [vmem:[#allocation7 + $0xa0] sm:$0xff] }
 0x325   : > { %v816_v56 = vmul.f32 %v2217_v50, %v2736_v33  ;;  %2096 = vmatpush3.msra.mxu0 %v1043_v9  ;;  %v1042_v33 = vld [vmem:[#allocation7 + $0x98] sm:$0xff]  ;;  %v1989_v9 = vld [vmem:[#allocation7 + $0x21] ss:$0 sm:$0xff] }
 0x326   : > { %v2219_v57 = vpop.eup %2218  ;;  %2097 = vmatprep.subr.mxu0 %v2401_v0 }
 0x327   : > { %v2221_v52 = vpop.eup %2220  ;;  %2087 = vmatprep.mubr.msk.f32.mxu0 %vm667_vm12, %v816_v56  ;;  %v819_v61 = vmul.f32 %v2219_v57, %v2740_v39  ;;  %2098 = vmatpush3.msra.mxu0 %v1042_v33  ;;  %v1040_v39 = vld [vmem:[#allocation7 + $0x88] sm:$0xff] }
 0x328   : > { %2088 = vmatmul.mubr.msk.f32.gmra.mxu0 %vm667_vm12, %v817_v54  ;;  %v818_v53 = vmul.f32 %v2221_v52, %v2205_v45  ;;  %2099 = vmatprep.subr.mxu0 %v2401_v0  ;;  %v1041_v45 = vld [vmem:[#allocation7 + $0x90] sm:$0xff] }
 0x329   : > { %2100 = vmatpush3.msra.mxu0 %v1041_v45 }
 0x32a   : > { %2090 = vmatprep.mubr.msk.f32.mxu0 %vm667_vm12, %v818_v53  ;;  %2101 = vmatprep.subr.mxu0 %v2401_v0 }
 0x32b   : > { %2102 = vmatpush3.msra.mxu0 %v1040_v39 }
 0x32c   : > { %2091 = vmatmul.mubr.msk.f32.gmra.mxu0 %vm667_vm12, %v819_v61  ;;  %2103 = vmatprep.subr.mxu0 %v2401_v0  ;;  %vm1326_vm12 = vcmask 130048  }
 0x32d   : > { %2109 = vmatprep.mubr.msk.f32.mxu0 %vm2402_vm0, %v2401_v0  ;;  %2104 = vmatpush3.msra.mxu0 %v1039_v55 }
 0x32e   : > { %2105 = vmatprep.subr.mxu0 %v2401_v0 }
 0x32f   : > { %2106 = vmatpush3.msra.mxu0 %v1038_v63 }
 0x330   : > { %2107 = vmatprep.subr.mxu0 %v2401_v0 }
 0x331   : > { %2108 = vmatpush3.msra.mxu0 %v1037_v58 }
 0x332   : > { %2112 = vmatprep.subr.mxu0 %v2401_v0 }
 0x3df   : > { %v2083_v10 = vpop.f32.mrf.mxu0 }
 0x3e0   : > { %v954_v37 = vmul.f32 %v2083_v10, %v2596_v8 }
 0x3e1   : > { %v914_v60 = vpop.f32.mrf.mxu0 }
 0x3e2   : > { %v968_v48 = vsel %vm481_vm10, %v954_v37, 0.0  ;;  %v953_v62 = vmul.f32 %v914_v60, %v2596_v8 }
 0x3e3   : > { %v969_v1 = vrot.slane %v968_v48, 4  ;;  %v2086_v2 = vpop.f32.mrf.mxu0 }
 0x3e4   : > { %v961_v3 = vsel %vm481_vm10, %v953_v62, 0.0  ;;  %v956_v4 = vmul.f32 %v2086_v2, %v2596_v8 }
 0x3e5   : > { %v970_v5 = vadd.f32 %v969_v1, %v968_v48  ;;  %v962_v43 = vrot.slane %v961_v3, 4  ;;  %v924_v7 = vpop.f32.mrf.mxu0 }
 0x3e6   : > { %v982_v28 = vsel %vm481_vm10, %v956_v4, 0.0  ;;  %v955_v29 = vmul.f32 %v924_v7, %v2596_v8 }
 0x3e7   : > { %v971_v30 = vrot.slane %v970_v5, 2  ;;  %v963_v32 = vadd.f32 %v962_v43, %v961_v3  ;;  %v983_v46 = vrot.slane %v982_v28, 4 }
 0x3e8   : > { %v975_v34 = vsel %vm481_vm10, %v955_v29, 0.0  ;;  %v2089_v35 = vpop.f32.mrf.mxu0 }
 0x3e9   : > { %v972_v36 = vadd.f32 %v971_v30, %v970_v5  ;;  %v964_v38 = vrot.slane %v963_v32, 2  ;;  %v984_v40 = vadd.f32 %v983_v46, %v982_v28  ;;  %v976_v41 = vrot.slane %v975_v34, 4 }
 0x3ea   : > { %v958_v51 = vmul.f32 %v2089_v35, %v2596_v8  ;;  %v934_v42 = vpop.f32.mrf.mxu0 }
 0x3eb   : > { %v973_v44 = vrot.slane %v972_v36, 1  ;;  %v965_v47 = vadd.f32 %v964_v38, %v963_v32  ;;  %v985_v49 = vrot.slane %v984_v40, 2  ;;  %v977_v50 = vadd.f32 %v976_v41, %v975_v34 }
 0x3ec   : > { %v996_v56 = vsel %vm481_vm10, %v958_v51, 0.0  ;;  %v957_v57 = vmul.f32 %v934_v42, %v2596_v8  ;;  %v2092_v54 = vpop.f32.mrf.mxu0 }
 0x3ed   : > { %v974_v52 = vadd.f32 %v973_v44, %v972_v36  ;;  %v966_v53 = vrot.slane %v965_v47, 1  ;;  %v986_v61 = vadd.f32 %v985_v49, %v984_v40  ;;  %v978_v59 = vrot.slane %v977_v50, 2 }
 0x3ee   : > { %v997_v33 = vrot.slane %v996_v56, 4  ;;  %v989_v45 = vsel %vm481_vm10, %v957_v57, 0.0  ;;  %v960_v39 = vmul.f32 %v2092_v54, %v2596_v8  ;;  %v944_v55 = vpop.f32.mrf.mxu0 }
 0x3ef   : > { %v987_v63 = vrot.slane %v986_v61, 1  ;;  %v979_v58 = vadd.f32 %v978_v59, %v977_v50  ;;  %v990_v37 = vrot.slane %v989_v45, 4  ;;  %v959_v48 = vmul.f32 %v944_v55, %v2596_v8 }
 0x3f0   : > { %v998_v10 = vadd.f32 %v997_v33, %v996_v56  ;;  %v1010_v60 = vsel %vm481_vm10, %v960_v39, 0.0  ;;  %v1022_v62 = vadd.f32 %v1989_v9, %v974_v52  ;;  %v967_v1 = vadd.f32 %v966_v53, %v965_v47 }
 0x3f1   : > { %v980_v2 = vrot.slane %v979_v58, 1  ;;  %v991_v4 = vadd.f32 %v990_v37, %v989_v45  ;;  %v1011_v5 = vrot.slane %v1010_v60, 4  ;;  %v1003_v43 = vsel %vm481_vm10, %v959_v48, 0.0 }
 0x3f2   : > { %v999_v3 = vrot.slane %v998_v10, 2  ;;  %v988_v7 = vadd.f32 %v987_v63, %v986_v61  ;;  %v1004_v46 = vrot.slane %v1003_v43, 4  ;;  %v1030_v34 = vmax.f32 %v1022_v62, 0.0 }
 0x3f3   : > { %v981_v28 = vadd.f32 %v980_v2, %v979_v58  ;;  %v992_v30 = vrot.slane %v991_v4, 2  ;;  %v1012_v32 = vadd.f32 %v1011_v5, %v1010_v60  ;;  %v1021_v35 = vadd.f32 %v1989_v9, %v967_v1 }
 0x3f4   : > { %v1000_v29 = vadd.f32 %v999_v3, %v998_v10  ;;  %v1005_v41 = vadd.f32 %v1004_v46, %v1003_v43  ;;  %v1024_v51 = vadd.f32 %v1989_v9, %v988_v7  ;;  %v1060_v56 = vrot.slane %v1030_v34, 7  ;;  %v1990_v34 = vld [vmem:[#allocation7 + $0x22] ss:$0 sm:$0xff] }
 0x3f5   : > { %v1023_v36 = vadd.f32 %v1989_v9, %v981_v28  ;;  %v993_v40 = vadd.f32 %v992_v30, %v991_v4  ;;  %v1013_v8 = vrot.slane %v1012_v32, 2  ;;  %v1029_v57 = vmax.f32 %v1021_v35, 0.0 }
 0x3f6   : > { %v1001_v38 = vrot.slane %v1000_v29, 1  ;;  %v1006_v50 = vrot.slane %v1005_v41, 2  ;;  %v1032_v59 = vmax.f32 %v1024_v51, 0.0 }
 0x3f7   : > { %v1031_v42 = vmax.f32 %v1023_v36, 0.0  ;;  %v994_v47 = vrot.slane %v993_v40, 1  ;;  %v1014_v49 = vadd.f32 %v1013_v8, %v1012_v32  ;;  %v1062_v63 = vsel %vm1061_vm13, %v1060_v56, %v1029_v57 }
 0x3f8   : > { %v1002_v44 = vadd.f32 %v1001_v38, %v1000_v29  ;;  %v1007_v53 = vadd.f32 %v1006_v50, %v1005_v41  ;;  %v1066_v48 = vrot.slane %v1032_v59, 5 }
 0x3f9   : > { %v995_v54 = vadd.f32 %v994_v47, %v993_v40  ;;  %v1015_v52 = vrot.slane %v1014_v49, 1  ;;  %v1063_v61 = vrot.slane %v1031_v42, 6 }
 0x3fa   : > { %v1026_v33 = vadd.f32 %v1989_v9, %v1002_v44  ;;  %v1008_v55 = vrot.slane %v1007_v53, 1 }
 0x3fb   : > { %v1025_v45 = vadd.f32 %v1989_v9, %v995_v54  ;;  %v1016_v39 = vadd.f32 %v1015_v52, %v1014_v49  ;;  %v1065_v37 = vsel %vm1064_vm14, %v1063_v61, %v1062_v63 }
 0x3fc   : > { %v1009_v60 = vadd.f32 %v1008_v55, %v1007_v53  ;;  %v1034_v62 = vmax.f32 %v1026_v33, 0.0  ;;  %v1068_v3 = vsel %vm1067_vm15, %v1066_v48, %v1065_v37 }
 0x3fd   : > { %v1033_v58 = vmax.f32 %v1025_v45, 0.0  ;;  %v1028_v10 = vadd.f32 %v1989_v9, %v1016_v39 }
 0x3fe   : > { %v1027_v2 = vadd.f32 %v1989_v9, %v1009_v60  ;;  %v1072_v7 = vrot.slane %v1034_v62, 3  ;;  %v1992_v9 = vld [vmem:[#allocation7 + $0x24] ss:$0 sm:$0xff] }
 0x3ff   : > { %v1069_v1 = vrot.slane %v1033_v58, 4  ;;  %v1036_v4 = vmax.f32 %v1028_v10, 0.0  ;;  %1283 = vrot.lane.b32.xlu0 %v1992_v9, %s2405_s4 }
 0x400   : > { %v1035_v43 = vmax.f32 %v1027_v2, 0.0 }
 0x401   : > { %v1071_v5 = vsel %vm1070_vm1, %v1069_v1, %v1068_v3  ;;  %v1078_v29 = vrot.slane %v1036_v4, 1 }
 0x402   : > { %v1075_v28 = vrot.slane %v1035_v43, 2  ;;  %v1074_v30 = vsel %vm1073_vm2, %v1072_v7, %v1071_v5 }
 0x403   : > { %1357 = vbcast.lane.b32.xlu0 %v2643_v12, 256 }
 0x404   : > { %v1077_v32 = vsel %vm1076_vm3, %v1075_v28, %v1074_v30 }
 0x405   : > { %v1080_v46 = vsel %vm1079_vm4, %v1078_v29, %v1077_v32 }
 0x406   : > { %2110 = vmatmul.mubr.msk.f32.vlgmr.msra.gmra.mxu0 %vm481_vm10, %v1080_v46 }
 0x407   : > { %2114 = vmatprep.mubr.msk.f32.mxu0 %vm2402_vm0, %v2401_v0 }
 0x471   : > { %v1284_v37 = vpop.permute.xlu0 %1283 }
 0x4c6   : > { %v1149_v35 = vpop.f32.mrf.mxu0 }
 0x4c7   : > { %v1150_v36 = vadd.f32 %v1990_v34, %v1149_v35 }
 0x4c8   : > { %v2111_v38 = vpop.f32.mrf.mxu0 }
 0x4c9   : > { %1243 = vrot.lane.b32.xlu1 %v1150_v36, %s2405_s4  ;;  %2113 = vmatpush3.msra.mxu0 %v1150_v36  ;;  %v1161_v40 = vrot.slane %v1150_v36, %v2604_v23  ;;  %v1154_v8 = vcombine.high %v1150_v36, %v1150_v36 }
 0x4cb   : > { %v1169_v41 = vcombine.high %v1161_v40, %v1161_v40  ;;  %v1168_v51 = vrot.slane %v1154_v8, %v2604_v23  ;;  %v1177_v0 = vrot.slane %v1161_v40, %v2604_v23 }
 0x4cd   : > { %1364 = vbcast.lane.b32.xlu1 %v2640_v11, 256  ;;  %v1191_v42 = vrot.slane %v1169_v41, %v2604_v23  ;;  %v1170_v44 = vcombine.high %v1168_v51, %v1168_v51  ;;  %v1184_v12 = vrot.slane %v1168_v51, %v2604_v23  ;;  %v1199_v47 = vcombine.high %v1177_v0, %v1177_v0 }
 0x4ce   : > { %v1206_v11 = vrot.slane %v1177_v0, %v2614_v31 }
 0x4cf   : > { %v1201_v49 = vcombine.high %v1191_v42, %v1191_v42  ;;  %v1198_v50 = vrot.slane %v1170_v44, %v2604_v23  ;;  %v1200_v56 = vcombine.high %v1184_v12, %v1184_v12  ;;  %v1210_v57 = vrot.slane %v1191_v42, %v2614_v31 }
 0x4d0   : > { %v1214_v54 = vrot.slane %v1199_v47, %v2614_v31  ;;  %v1222_v61 = vrot.slane %v1184_v12, %v2614_v31  ;;  %v1358_v12 = vpop.permute.xlu0 %1357 }
 0x4d1   : > { %v1218_v52 = vrot.slane %v1201_v49, %v2614_v31  ;;  %v1226_v59 = vrot.slane %v1198_v50, %v2614_v31  ;;  %v1202_v33 = vcombine.high %v1198_v50, %v1198_v50  ;;  %v1230_v10 = vrot.slane %v1200_v56, %v2614_v31 }
 0x4d3   : > { %v1234_v4 = vrot.slane %v1202_v33, %v2614_v31 }
 0x53b   : > { %v1244_v53 = vpop.permute.xlu1 %1243 }
 0x53c   : > { %v1246_v45 = vadd.f32 %v1244_v53, %v1206_v11  ;;  %v1247_v39 = vadd.f32 %v1244_v53, %v1210_v57  ;;  %v1248_v55 = vadd.f32 %v1244_v53, %v1214_v54  ;;  %v1249_v63 = vadd.f32 %v1244_v53, %v1218_v52 }
 0x53d   : > { %v1250_v23 = vadd.f32 %v1244_v53, %v1222_v61  ;;  %v1251_v58 = vadd.f32 %v1244_v53, %v1226_v59  ;;  %v1252_v7 = vadd.f32 %v1244_v53, %v1230_v10  ;;  %v1253_v32 = vadd.f32 %v1244_v53, %v1234_v4 }
 0x53e   : > { %vm1254_vm0 = vcmp.gt.f32.partialorder %v1246_v45, 0.0  ;;  %v1262_v60 = vmul.f32 0.2, %v1246_v45  ;;  %vm1255_vm5 = vcmp.gt.f32.partialorder %v1247_v39, 0.0  ;;  %v1263_v48 = vmul.f32 0.2, %v1247_v39 }
 0x53f   : > { %vm1256_vm6 = vcmp.gt.f32.partialorder %v1248_v55, 0.0  ;;  %v1264_v62 = vmul.f32 0.2, %v1248_v55  ;;  %vm1257_vm7 = vcmp.gt.f32.partialorder %v1249_v63, 0.0  ;;  %v1265_v1 = vmul.f32 0.2, %v1249_v63  ;;  %v1365_v47 = vpop.permute.xlu1 %1364 }
 0x540   : > { %v1270_v2 = vsel %vm1254_vm0, %v1246_v45, %v1262_v60  ;;  %v1271_v3 = vsel %vm1255_vm5, %v1247_v39, %v1263_v48  ;;  %v1266_v30 = vmul.f32 0.2, %v1250_v23  ;;  %vm1258_vm8 = vcmp.gt.f32.partialorder %v1250_v23, 0.0 }
 0x541   : > { %v1286_v5 = vmul.f32 %v1284_v37, %v1270_v2  ;;  %v1287_v43 = vmul.f32 %v1284_v37, %v1271_v3  ;;  %v1272_v28 = vsel %vm1256_vm6, %v1248_v55, %v1264_v62  ;;  %v1273_v29 = vsel %vm1257_vm7, %v1249_v63, %v1265_v1 }
 0x542   : > { %vm1259_vm9 = vcmp.gt.f32.partialorder %v1251_v58, 0.0  ;;  %v1267_v46 = vmul.f32 0.2, %v1251_v58  ;;  %v1288_v9 = vmul.f32 %v1284_v37, %v1272_v28  ;;  %v1289_v34 = vmul.f32 %v1284_v37, %v1273_v29 }
 0x543   : > { %1302 = vrot.lane.b32.xlu1 %v1286_v5, %s2406_s10  ;;  %1304 = vrot.lane.b32.xlu0 %v1287_v43, %s2406_s10  ;;  %v1274_v35 = vsel %vm1258_vm8, %v1250_v23, %v1266_v30  ;;  %v1268_v38 = vmul.f32 0.2, %v1252_v7  ;;  %v1269_v40 = vmul.f32 0.2, %v1253_v32  ;;  %vm1260_vm10 = vcmp.gt.f32.partialorder %v1252_v7, 0.0 }
 0x544   : > { %v1275_v36 = vsel %vm1259_vm9, %v1251_v58, %v1267_v46  ;;  %vm1261_vm11 = vcmp.gt.f32.partialorder %v1253_v32, 0.0  ;;  %v1290_v8 = vmul.f32 %v1284_v37, %v1274_v35  ;;  %v2407_v39 = vmov 0  }
 0x545   : > { %v1291_v41 = vmul.f32 %v1284_v37, %v1275_v36  ;;  %v1276_v51 = vsel %vm1260_vm10, %v1252_v7, %v1268_v38  ;;  %v1277_v0 = vsel %vm1261_vm11, %v1253_v32, %v1269_v40  ;;  %2189 = vset.pattern.permute.xlu0 %v2407_v39  ;;  %2188 = vset.pattern.permute.xlu1 %v2407_v39  ;;  %v1457_v46 = vand.u32 127, %v337_v20 }
 0x546   : > { %v1292_v42 = vmul.f32 %v1284_v37, %v1276_v51  ;;  %v1293_v44 = vmul.f32 %v1284_v37, %v1277_v0  ;;  %vm1498_vm0 = vcmask 64512  }
 0x547   : > { %1306 = vrot.lane.b32.xlu1 %v1288_v9, %s2406_s10  ;;  %1308 = vrot.lane.b32.xlu0 %v1289_v34, %s2406_s10  ;;  %v2830_v34 = vsub.s32 %v1457_v46, %v2601_v22 }
 0x54b   : > { %1310 = vrot.lane.b32.xlu1 %v1290_v8, %s2406_s10  ;;  %1312 = vrot.lane.b32.xlu0 %v1291_v41, %s2406_s10 }
 0x54f   : > { %1314 = vrot.lane.b32.xlu1 %v1292_v42, %s2406_s10  ;;  %1316 = vrot.lane.b32.xlu0 %v1293_v44, %s2406_s10 }
 0x553   : > { %1371 = vbcast.lane.b32.xlu1 %v2657_v16, 256  ;;  %1378 = vbcast.lane.b32.xlu0 %v2654_v15, 256 }
 0x557   : > { %1385 = vbcast.lane.b32.xlu1 %v2671_v21, 256  ;;  %1392 = vbcast.lane.b32.xlu0 %v2668_v19, 256 }
 0x5b5   : > { %v1303_v49 = vpop.permute.xlu1 %1302  ;;  %v1305_v50 = vpop.permute.xlu0 %1304 }
 0x5b6   : > { %v1327_v56 = vsel %vm1326_vm12, %v1303_v49, 0.0  ;;  %v1330_v11 = vsel %vm1326_vm12, %v1305_v50, 0.0 }
 0x5b7   : > { %1328 = vadd.xlane.f32.xlu1 %v1327_v56  ;;  %1331 = vadd.xlane.f32.xlu0 %v1330_v11 }
 0x5b9   : > { %v1307_v57 = vpop.permute.xlu1 %1306  ;;  %v1309_v54 = vpop.permute.xlu0 %1308 }
 0x5ba   : > { %v1336_v16 = vsel %vm1326_vm12, %v1309_v54, 0.0  ;;  %v1333_v15 = vsel %vm1326_vm12, %v1307_v57, 0.0 }
 0x5bb   : > { %1337 = vadd.xlane.f32.xlu1 %v1336_v16  ;;  %1334 = vadd.xlane.f32.xlu0 %v1333_v15 }
 0x5bd   : > { %v1311_v19 = vpop.permute.xlu1 %1310  ;;  %v1313_v21 = vpop.permute.xlu0 %1312 }
 0x5be   : > { %v1342_v52 = vsel %vm1326_vm12, %v1313_v21, 0.0  ;;  %v1339_v53 = vsel %vm1326_vm12, %v1311_v19, 0.0 }
 0x5bf   : > { %1343 = vadd.xlane.f32.xlu1 %v1342_v52  ;;  %1340 = vadd.xlane.f32.xlu0 %v1339_v53 }
 0x5c1   : > { %v1315_v61 = vpop.permute.xlu1 %1314  ;;  %v1317_v59 = vpop.permute.xlu0 %1316 }
 0x5c2   : > { %v1345_v33 = vsel %vm1326_vm12, %v1315_v61, 0.0  ;;  %v1348_v45 = vsel %vm1326_vm12, %v1317_v59, 0.0 }
 0x5c3   : > { %1346 = vadd.xlane.f32.xlu0 %v1345_v33  ;;  %1349 = vadd.xlane.f32.xlu1 %v1348_v45 }
 0x5c5   : > { %v1372_v55 = vpop.permute.xlu1 %1371  ;;  %v1379_v63 = vpop.permute.xlu0 %1378 }
 0x5c9   : > { %v1386_v23 = vpop.permute.xlu1 %1385  ;;  %v1393_v58 = vpop.permute.xlu0 %1392 }
 0x5d4   : > { %1399 = vbcast.lane.b32.xlu1 %v2685_v27, 256 }
 0x5d9   : > { %1406 = vbcast.lane.b32.xlu0 %v2682_v26, 256 }
 0x640   : > { %v1329_v10 = vpop.xlane.xlu1 %1328  ;;  %v1332_v37 = vpop.xlane.xlu0 %1331 }
 0x641   : > { %v1416_v60 = vadd.f32 %v1358_v12, %v1329_v10  ;;  %v1417_v48 = vadd.f32 %v1365_v47, %v1332_v37 }
 0x643   : > { %1433 = vperm.xlu1 %2188, %v1416_v60   ;;  %1436 = vperm.xlu0 %2189, %v1417_v48  }
 0x644   : > { %v1338_v62 = vpop.xlane.xlu1 %1337  ;;  %v1335_v1 = vpop.xlane.xlu0 %1334 }
 0x645   : > { %v1418_v2 = vadd.f32 %v1372_v55, %v1335_v1  ;;  %v1419_v5 = vadd.f32 %v1379_v63, %v1338_v62 }
 0x647   : > { %1439 = vperm.xlu1 %2188, %v1418_v2  }
 0x648   : > { %v1344_v3 = vpop.xlane.xlu1 %1343  ;;  %v1341_v4 = vpop.xlane.xlu0 %1340 }
 0x649   : > { %v1420_v27 = vadd.f32 %v1386_v23, %v1341_v4  ;;  %v1421_v7 = vadd.f32 %v1393_v58, %v1344_v3 }
 0x64b   : > { %1442 = vperm.xlu1 %2188, %v1419_v5   ;;  %1445 = vperm.xlu0 %2189, %v1420_v27  }
 0x64c   : > { %v1350_v26 = vpop.xlane.xlu1 %1349  ;;  %v1347_v43 = vpop.xlane.xlu0 %1346 }
 0x64f   : > { %1448 = vperm.xlu1 %2188, %v1421_v7  }
 0x650   : > { %v1400_v28 = vpop.permute.xlu1 %1399  ;;  %v1407_v29 = vpop.permute.xlu0 %1406 }
 0x651   : > { %v1422_v30 = vadd.f32 %v1400_v28, %v1347_v43  ;;  %v1423_v32 = vadd.f32 %v1407_v29, %v1350_v26 }
 0x653   : > { %1451 = vperm.xlu0 %2189, %v1422_v30   ;;  %1454 = vperm.xlu1 %2188, %v1423_v32  }
 0x6be   : > { %v1434_v9 = vpop.permute.xlu1 %1433  ;;  %v1437_v36 = vpop.permute.xlu0 %1436 }
 0x6bf   : > { %v1461_v38 = vrot.slane %v1434_v9, %v2830_v34  ;;  %v1465_v40 = vrot.slane %v1437_v36, %v2830_v34 }
 0x6c1   : > { %v1490_v42 = vsel %vm1061_vm13, %v1465_v40, %v1461_v38 }
 0x6c2   : > { %v1440_v35 = vpop.permute.xlu1 %1439 }
 0x6c3   : > { %v1469_v41 = vrot.slane %v1440_v35, %v2830_v34 }
 0x6c5   : > { %v1491_v20 = vsel %vm1064_vm14, %v1469_v41, %v1490_v42 }
 0x6c6   : > { %v1443_v8 = vpop.permute.xlu1 %1442  ;;  %v1446_v0 = vpop.permute.xlu0 %1445 }
 0x6c7   : > { %v1473_v51 = vrot.slane %v1443_v8, %v2830_v34  ;;  %v1477_v22 = vrot.slane %v1446_v0, %v2830_v34 }
 0x6c9   : > { %v1492_v12 = vsel %vm1067_vm15, %v1473_v51, %v1491_v20 }
 0x6ca   : > { %v1449_v44 = vpop.permute.xlu1 %1448  ;;  %v1493_v56 = vsel %vm1070_vm1, %v1477_v22, %v1492_v12 }
 0x6cb   : > { %v1481_v47 = vrot.slane %v1449_v44, %v2830_v34 }
 0x6cd   : > { %v1494_v54 = vsel %vm1073_vm2, %v1481_v47, %v1493_v56 }
 0x6ce   : > { %v1455_v49 = vpop.permute.xlu1 %1454  ;;  %v1452_v50 = vpop.permute.xlu0 %1451 }
 0x6cf   : > { %v1489_v11 = vrot.slane %v1455_v49, %v2830_v34  ;;  %v1485_v57 = vrot.slane %v1452_v50, %v2830_v34 }
 0x6d1   : > { %v1495_v16 = vsel %vm1076_vm3, %v1485_v57, %v1494_v54 }
 0x6d2   : > { %v1496_v15 = vsel %vm1079_vm4, %v1489_v11, %v1495_v16 }
 0x6d3   : > { %v1499_v19 = vsel %vm1498_vm0, %v1496_v15, -inf }
 0x6d4   : > { %1500 = vmax.xlane.f32.xlu0 %v1499_v19 }
 0x75d   : > { %v1501_v21 = vpop.xlane.xlu0 %1500 }
 0x75e   : > { %v1506_v52 = vrot.slane %v1501_v21, %v2614_v31  ;;  %v1510_v53 = vrot.slane %v1501_v21, %v2633_v6  ;;  %v1514_v61 = vrot.slane %v1501_v21, %v2649_v14  ;;  %v1518_v39 = vrot.slane %v1501_v21, %v2646_v13 }
 0x75f   : > { %v1522_v23 = vrot.slane %v1501_v21, %v2663_v18  ;;  %v1526_v37 = vrot.slane %v1501_v21, %v2660_v17  ;;  %v1530_v3 = vrot.slane %v1501_v21, %v2677_v25 }
 0x760   : > { %v1543_v59 = vsub.f32 %v1416_v60, %v1506_v52  ;;  %v1544_v33 = vsub.f32 %v1417_v48, %v1510_v53  ;;  %v1545_v55 = vsub.f32 %v1418_v2, %v1514_v61  ;;  %v1546_v58 = vsub.f32 %v1419_v5, %v1518_v39 }
 0x761   : > { %v1547_v62 = vsub.f32 %v1420_v27, %v1522_v23  ;;  %v1548_v60 = vsub.f32 %v1421_v7, %v1526_v37  ;;  %v1534_v2 = vrot.slane %v1501_v21, %v2674_v24  ;;  %v1549_v26 = vsub.f32 %v1422_v30, %v1530_v3 }
 0x762   : > { %v1551_v45 = vmul.f32 1.442695, %v1543_v59  ;;  %v1553_v63 = vmul.f32 1.442695, %v1544_v33  ;;  %v1555_v10 = vmul.f32 1.442695, %v1545_v55 }
 0x763   : > { %v1557_v1 = vmul.f32 1.442695, %v1546_v58  ;;  %v1559_v48 = vmul.f32 1.442695, %v1547_v62  ;;  %v1561_v43 = vmul.f32 1.442695, %v1548_v60  ;;  %v1550_v28 = vsub.f32 %v1423_v32, %v1534_v2 }
 0x764   : > { %2222 = vpow2.f32 %v1551_v45  ;;  %v1563_v29 = vmul.f32 1.442695, %v1549_v26 }
 0x765   : > { %2224 = vpow2.f32 %v1553_v63  ;;  %v1565_v46 = vmul.f32 1.442695, %v1550_v28 }
 0x766   : > { %2226 = vpow2.f32 %v1555_v10 }
 0x767   : > { %2228 = vpow2.f32 %v1557_v1 }
 0x768   : > { %2230 = vpow2.f32 %v1559_v48 }
 0x769   : > { %2232 = vpow2.f32 %v1561_v43 }
 0x76a   : > { %2234 = vpow2.f32 %v1563_v29 }
 0x76b   : > { %2236 = vpow2.f32 %v1565_v46 }
 0x771   : > { %v2223_v4 = vpop.eup %2222 }
 0x772   : > { %1576 = vperm.xlu1 %2188, %v2223_v4   ;;  %v2225_v5 = vpop.eup %2224 }
 0x773   : > { %v2227_v27 = vpop.eup %2226 }
 0x774   : > { %v2229_v9 = vpop.eup %2228 }
 0x775   : > { %v2231_v7 = vpop.eup %2230 }
 0x776   : > { %1579 = vperm.xlu1 %2188, %v2225_v5   ;;  %v2233_v35 = vpop.eup %2232 }
 0x777   : > { %v2235_v36 = vpop.eup %2234 }
 0x778   : > { %v2237_v30 = vpop.eup %2236 }
 0x77a   : > { %1582 = vperm.xlu1 %2188, %v2227_v27  }
 0x77e   : > { %1585 = vperm.xlu1 %2188, %v2229_v9  }
 0x782   : > { %1588 = vperm.xlu1 %2188, %v2231_v7  }
 0x786   : > { %1591 = vperm.xlu1 %2188, %v2233_v35  }
 0x78a   : > { %1594 = vperm.xlu1 %2188, %v2235_v36  }
 0x78e   : > { %1597 = vperm.xlu1 %2188, %v2237_v30  }
 0x7ed   : > { %v1577_v38 = vpop.permute.xlu1 %1576 }
 0x7ee   : > { %v1602_v44 = vrot.slane %v1577_v38, %v2830_v34 }
 0x7f1   : > { %v1580_v40 = vpop.permute.xlu1 %1579 }
 0x7f2   : > { %v1606_v0 = vrot.slane %v1580_v40, %v2830_v34 }
 0x7f4   : > { %v1631_v47 = vsel %vm1061_vm13, %v1606_v0, %v1602_v44 }
 0x7f5   : > { %v1583_v32 = vpop.permute.xlu1 %1582 }
 0x7f6   : > { %v1610_v42 = vrot.slane %v1583_v32, %v2830_v34  ;;  %v1993_v32 = vld [vmem:[#allocation7 + $0x23] ss:$0 sm:$0xff] }
 0x7f8   : > { %v1632_v50 = vsel %vm1064_vm14, %v1610_v42, %v1631_v47 }
 0x7f9   : > { %v1586_v8 = vpop.permute.xlu1 %1585 }
 0x7fa   : > { %v1614_v20 = vrot.slane %v1586_v8, %v2830_v34 }
 0x7fc   : > { %v1633_v11 = vsel %vm1067_vm15, %v1614_v20, %v1632_v50 }
 0x7fd   : > { %v1589_v41 = vpop.permute.xlu1 %1588 }
 0x7fe   : > { %v1618_v22 = vrot.slane %v1589_v41, %v2830_v34 }
 0x800   : > { %v1634_v57 = vsel %vm1070_vm1, %v1618_v22, %v1633_v11 }
 0x801   : > { %v1592_v51 = vpop.permute.xlu1 %1591 }
 0x802   : > { %v1622_v49 = vrot.slane %v1592_v51, %v2830_v34 }
 0x804   : > { %v1635_v16 = vsel %vm1073_vm2, %v1622_v49, %v1634_v57 }
 0x805   : > { %v1595_v12 = vpop.permute.xlu1 %1594 }
 0x806   : > { %v1626_v56 = vrot.slane %v1595_v12, %v2830_v34 }
 0x808   : > { %v1636_v19 = vsel %vm1076_vm3, %v1626_v56, %v1635_v16 }
 0x809   : > { %v1598_v54 = vpop.permute.xlu1 %1597 }
 0x80a   : > { %v1630_v15 = vrot.slane %v1598_v54, %v2830_v34 }
 0x80c   : > { %v1637_v21 = vsel %vm1079_vm4, %v1630_v15, %v1636_v19 }
 0x80d   : > { %v1639_v52 = vsel %vm1498_vm0, %v1637_v21, 0.0 }
 0x80e   : > { %1640 = vadd.xlane.f32.xlu0 %v1639_v52 }
 0x897   : > { %v1641_v53 = vpop.xlane.xlu0 %1640 }
 0x898   : > { %2238 = vrcp.f32 %v1641_v53 }
 0x8a5   : > { %v2239_v61 = vpop.eup %2238 }
 0x8a6   : > { %v1651_v59 = vrot.slane %v2239_v61, %v2633_v6  ;;  %v1647_v33 = vrot.slane %v2239_v61, %v2614_v31  ;;  %v1655_v55 = vrot.slane %v2239_v61, %v2649_v14  ;;  %v1659_v23 = vrot.slane %v2239_v61, %v2646_v13 }
 0x8a7   : > { %v1663_v10 = vrot.slane %v2239_v61, %v2663_v18  ;;  %v1667_v62 = vrot.slane %v2239_v61, %v2660_v17  ;;  %v1671_v31 = vrot.slane %v2239_v61, %v2677_v25  ;;  %v1675_v14 = vrot.slane %v2239_v61, %v2674_v24 }
 0x8a8   : > { %v1685_v45 = vmul.f32 %v2225_v5, %v1651_v59  ;;  %v1684_v39 = vmul.f32 %v2223_v4, %v1647_v33  ;;  %v1686_v63 = vmul.f32 %v2227_v27, %v1655_v55  ;;  %v1687_v58 = vmul.f32 %v2229_v9, %v1659_v23 }
 0x8a9   : > { %v1688_v37 = vmul.f32 %v2231_v7, %v1663_v10  ;;  %v1689_v6 = vmul.f32 %v2233_v35, %v1667_v62  ;;  %v1690_v1 = vmul.f32 %v2235_v36, %v1671_v31  ;;  %v1691_v3 = vmul.f32 %v2237_v30, %v1675_v14 }
 0x8aa   : > { %1708 = vperm.xlu0 %2189, %v1685_v45   ;;  %1705 = vperm.xlu1 %2188, %v1684_v39  }
 0x8ae   : > { %1711 = vperm.xlu1 %2188, %v1686_v63  }
 0x8b2   : > { %1714 = vperm.xlu1 %2188, %v1687_v58  }
 0x8b6   : > { %1717 = vperm.xlu1 %2188, %v1688_v37  }
 0x8ba   : > { %1720 = vperm.xlu1 %2188, %v1689_v6  }
 0x8be   : > { %1723 = vperm.xlu1 %2188, %v1690_v1  }
 0x8c2   : > { %1726 = vperm.xlu1 %2188, %v1691_v3  }
 0x925   : > { %v1706_v13 = vpop.permute.xlu1 %1705  ;;  %v1709_v18 = vpop.permute.xlu0 %1708 }
 0x926   : > { %v1735_v26 = vrot.slane %v1709_v18, %v2830_v34  ;;  %v1731_v17 = vrot.slane %v1706_v13, %v2830_v34 }
 0x928   : > { %v1760_v28 = vsel %vm1061_vm13, %v1735_v26, %v1731_v17 }
 0x929   : > { %v1712_v60 = vpop.permute.xlu1 %1711 }
 0x92a   : > { %v1739_v43 = vrot.slane %v1712_v60, %v2830_v34 }
 0x92c   : > { %v1761_v27 = vsel %vm1064_vm14, %v1739_v43, %v1760_v28 }
 0x92d   : > { %v1715_v48 = vpop.permute.xlu1 %1714 }
 0x92e   : > { %v1743_v25 = vrot.slane %v1715_v48, %v2830_v34 }
 0x930   : > { %v1762_v9 = vsel %vm1067_vm15, %v1743_v25, %v1761_v27 }
 0x931   : > { %v1718_v4 = vpop.permute.xlu1 %1717 }
 0x932   : > { %v1747_v5 = vrot.slane %v1718_v4, %v2830_v34 }
 0x934   : > { %v1763_v7 = vsel %vm1070_vm1, %v1747_v5, %v1762_v9 }
 0x935   : > { %v1721_v2 = vpop.permute.xlu1 %1720 }
 0x936   : > { %v1751_v29 = vrot.slane %v1721_v2, %v2830_v34 }
 0x938   : > { %v1764_v36 = vsel %vm1073_vm2, %v1751_v29, %v1763_v7 }
 0x939   : > { %v1724_v24 = vpop.permute.xlu1 %1723 }
 0x93a   : > { %v1755_v46 = vrot.slane %v1724_v24, %v2830_v34 }
 0x93c   : > { %v1765_v38 = vsel %vm1076_vm3, %v1755_v46, %v1764_v36 }
 0x93d   : > { %v1727_v35 = vpop.permute.xlu1 %1726 }
 0x93e   : > { %v1759_v30 = vrot.slane %v1727_v35, %v2830_v34 }
 0x940   : > { %v1766_v40 = vsel %vm1079_vm4, %v1759_v30, %v1765_v38 }
 0x941   : > { %2115 = vmatmul.mubr.msk.f32.vlgmr.msra.gmra.mxu0 %vm1498_vm0, %v1766_v40 }
 0xa01   : > { %v1835_v8 = vpop.f32.mrf.mxu0 }
 0xa02   : > { %v1836_v41 = vadd.f32 %v1993_v32, %v1835_v8 }
 0xa03   : > { %v2116_v51 = vpop.f32.mrf.mxu0 }
 0xa04   : > { %v1839_v0 = vmax.f32 %v1836_v41, 0.0 }
 0xa06   : > { %1840 = vst.msk [vmem:[%s236_s8] sm:$0xff] %vm1326_vm12, %v1839_v0 }
 0xa07   : > { %2335 = shalt.err (!%p2332_p9)
}
 0xa08   : > { %s2336_s21 = scalar_lea.hbm %s1853_s17, 128  ;;  %s2340_s23 = scalar_lea.hbm %s2935_s3, 512 }
 0xa09   : > { %p2337_p1 = scmp.ne.s32.totalorder %s1853_s17, %s2336_s21  ;;  %p2341_p7 = scmp.lt.s32.totalorder %s1853_s17, %s2935_s3 }
 0xa0a   : > { %p2342_p10 = scmp.lt.s32.totalorder %s2340_s23, %s2336_s21 }
 0xa0b   : > { %p2338_p4 = pnand %p2337_p1, %p2951_p11 }
 0xa0c   : > { %p2343_p8 = por %p2342_p10, %p2341_p7 }
 0xa0d   : > { %p2339_p6 = pneg %p2338_p4 }
 0xa0f   : > { %p2344_p3 = pnand %p2343_p8, %p2339_p6 }
 0xa11   : > { %2347 = shalt.err (!%p2344_p3)
}
 0xa12   : > { %2125 = dma.vmem_to_hbm [thread:$0]  (%p2951_p11), %s1856_s25, 128, %s1853_s17, %s1842_s22  }
 0xa13 PF: > { %p2145_p12 = scmp.ge.s32.totalorder %s2394_s15, 2  ;;  %s1867_s4 = sand.u32 1, %s2382_s12  }
 0xa14   : > { %p2952_p2 = scmp.ne.s32.totalorder %s2941_s19, 0  ;;  %s1868_s10 = scalar_lea.sflag [#allocation4], %s1867_s4 }
 0xa16   : > { %p2139_p13 = pnand %p2145_p12, %p2952_p2 }
 0xa18   : > { %p2140_p0 = pneg %p2139_p13 }
 0xa1a   : > { %2377 = dma.done.wait (%p2140_p0), %s1868_s10, 128  }
 0xa1b   : > { %2379 = vsyncadd (%p2140_p0), %s1868_s10, 4294967168  ;;  %p19_p5 = scmp.ge.s32.totalorder %s2482_s24, 6   ;;  %s2953_s12 = smov %s2386_s13 }
 0xa1c   : > { %s2954_s13 = smov %s2390_s14  ;;  %s2955_s14 = smov %s2499_s5 }
 0xa1d   : > { %s2956_s15 = smov %s2482_s24  ;;  %21 = sbr.rel (!%p19_p5) target bundleno = 7 (0x7), region = 94 }
 0xa22   :  { %1873 = vsyncpa [#allocation3], 1 }
 0xa23   :  { %1875 = vsyncpa [#allocation3 + $0x1], 1 }
 0xa24   :  { %1876 = vsyncpa [#allocation6], 1 }
 0xa25   :  { %1878 = vsyncpa [#allocation6 + $0x1], 1 }
 0xa26   :  { %1879 = vsyncpa [#allocation4], 1 }
 0xa27   :  { %1881 = vsyncpa [#allocation4 + $0x1], 1 }

</bundles_post_ra>
